<compile_context>
chip_gen: v6e
topology: v6e:2x2x1
jax: 0.10.0
libtpu: 0.0.40
codegen_flags: <defaults>
</compile_context>

<pallas_src>
import functools

import jax
import jax.numpy as jnp
import numpy as np
from jax.experimental import pallas as pl
from jax.experimental.pallas import tpu as pltpu


def conv3x3_act_kernel(xpad_ref, w_ref, b_ref, o_ref, *, apply_sigmoid):
    """One image: 3x3 conv (stride=1, pad=1) + bias + activation.

    xpad_ref : (1, H+2, W+2, Cin)  bf16 zero-padded NHWC input
    w_ref    : (9*Cin, Cout)       bf16 weights, rows ordered (dy, dx, cin)
    b_ref    : (1, Cout)           f32 bias
    o_ref    : (1, H*W, Cout)      bf16 (hidden layers) / f32 (final layer)
    """
    H = xpad_ref.shape[1] - 2
    W = xpad_ref.shape[2] - 2
    Cin = xpad_ref.shape[3]

    x = xpad_ref[0]  # (H+2, W+2, Cin)
    # im2col along the contraction dim -> single large-K MXU matmul.
    cols = [x[dy:dy + H, dx:dx + W, :] for dy in range(3) for dx in range(3)]
    patch = jnp.concatenate(cols, axis=-1).reshape(H * W, 9 * Cin)

    acc = jnp.dot(patch, w_ref[...], preferred_element_type=jnp.float32)
    acc = acc + b_ref[...]  # (1, Cout) broadcasts over rows

    if apply_sigmoid:
        acc = 1.0 / (1.0 + jnp.exp(-acc))   # sigmoid via EUP exp
    else:
        acc = jnp.maximum(acc, 0.0)         # ReLU

    o_ref[0] = acc.astype(o_ref.dtype)


def conv3x3_act(x_nhwc, w_oihw, b, *, apply_sigmoid, out_dtype):
    """3x3 conv + bias + activation over a batch of NHWC images."""
    N, H, W, Cin = x_nhwc.shape
    Cout = w_oihw.shape[0]

    # Glue: pad once in the wrapper, reshape weights OIHW -> (kh*kw*Cin, Cout)
    # with row order (dy, dx, cin) to match the kernel's im2col order.
    xpad = jnp.pad(x_nhwc.astype(jnp.bfloat16), ((0, 0), (1, 1), (1, 1), (0, 0)))
    wmat = (jnp.transpose(w_oihw, (2, 3, 1, 0))          # (kh, kw, Cin, Cout)
            .reshape(9 * Cin, Cout).astype(jnp.bfloat16))
    bvec = b.reshape(1, Cout).astype(jnp.float32)

    out_itemsize = jnp.dtype(out_dtype).itemsize
    cost = pl.CostEstimate(
        flops=2 * N * H * W * 9 * Cin * Cout,
        transcendentals=(N * H * W * Cout) if apply_sigmoid else 0,
        bytes_accessed=(N * (H + 2) * (W + 2) * Cin * 2
                        + 9 * Cin * Cout * 2
                        + Cout * 4
                        + N * H * W * Cout * out_itemsize),
    )

    out = pl.pallas_call(
        functools.partial(conv3x3_act_kernel, apply_sigmoid=apply_sigmoid),
        out_shape=jax.ShapeDtypeStruct((N, H * W, Cout), out_dtype),
        grid=(N,),
        in_specs=[
            pl.BlockSpec((1, H + 2, W + 2, Cin), lambda n: (n, 0, 0, 0)),  # padded x
            pl.BlockSpec((9 * Cin, Cout), lambda n: (0, 0)),               # weights
            pl.BlockSpec((1, Cout), lambda n: (0, 0)),                     # bias
        ],
        out_specs=pl.BlockSpec((1, H * W, Cout), lambda n: (n, 0, 0)),
        compiler_params=pltpu.CompilerParams(dimension_semantics=("parallel",)),
        cost_estimate=cost,
    )(xpad, wmat, bvec)

    return out.reshape(N, H, W, Cout)


def classification_model_forward(x_nchw, params, num_anchors, num_classes):
    """Matches ClassificationModel.forward: 4x(conv3x3+ReLU), conv3x3+Sigmoid,
    then permute/view to (N, H*W*num_anchors, num_classes)."""
    x = jnp.transpose(x_nchw, (0, 2, 3, 1))  # NCHW -> NHWC
    for name in ("conv1", "conv2", "conv3", "conv4"):
        w, b = params[name]
        x = conv3x3_act(x, w, b, apply_sigmoid=False, out_dtype=jnp.bfloat16)
    w, b = params["output"]
    out = conv3x3_act(x, w, b, apply_sigmoid=True, out_dtype=jnp.float32)
    N, H, W, _ = out.shape
    # permute(0,2,3,1).view(N,H,W,A,K).view(N,-1,K) == reshape of the NHWC tensor.
    return out.reshape(N, H * W * num_anchors, num_classes)


def _reference(x_nchw, params, num_anchors, num_classes):
    """Plain-JAX f32 reference for sanity checking."""
    def conv(x, w, b):
        y = jax.lax.conv_general_dilated(
            x, w, window_strides=(1, 1), padding=((1, 1), (1, 1)),
            dimension_numbers=("NCHW", "OIHW", "NCHW"))
        return y + b.reshape(1, -1, 1, 1)

    out = x_nchw
    for name in ("conv1", "conv2", "conv3", "conv4"):
        w, b = params[name]
        out = jnp.maximum(conv(out, w, b), 0.0)
    w, b = params["output"]
    out = jax.nn.sigmoid(conv(out, w, b))
    out = jnp.transpose(out, (0, 2, 3, 1))  # NHWC
    n, h, ww, _ = out.shape
    return out.reshape(n, h * ww * num_anchors, num_classes)


if __name__ == "__main__":
    key = jax.random.PRNGKey(0)
    ks = jax.random.split(key, 11)

    # Small but MXU/lane-friendly shapes consistent with the module
    # (defaults are feature_size=256, num_anchors=9, num_classes=80).
    N = 2
    num_features_in = 128
    feature_size = 128
    num_anchors = 4
    num_classes = 32           # num_anchors * num_classes = 128 -> lane-dense out
    H = W = 16

    def conv_init(kw, kb, cin, cout):
        w = jax.random.normal(kw, (cout, cin, 3, 3), jnp.float32) * np.sqrt(2.0 / (9 * cin))
        b = 0.1 * jax.random.normal(kb, (cout,), jnp.float32)
        return w, b

    params = {
        "conv1": conv_init(ks[0], ks[1], num_features_in, feature_size),
        "conv2": conv_init(ks[2], ks[3], feature_size, feature_size),
        "conv3": conv_init(ks[4], ks[5], feature_size, feature_size),
        "conv4": conv_init(ks[6], ks[7], feature_size, feature_size),
        "output": conv_init(ks[8], ks[9], feature_size, num_anchors * num_classes),
    }

    x = jax.random.normal(ks[10], (N, num_features_in, H, W), jnp.float32)

    out = classification_model_forward(x, params, num_anchors, num_classes)
    out = jax.block_until_ready(out)
    assert out.shape == (N, H * W * num_anchors, num_classes)

    ref = jax.block_until_ready(_reference(x, params, num_anchors, num_classes))
    # bf16 MXU operands vs f32 reference -> relaxed tolerance.
    np.testing.assert_allclose(np.asarray(out), np.asarray(ref), rtol=3e-2, atol=3e-2)

    print("KERNEL_OK")
</pallas_src>

<mosaic_0001>
module attributes {stable_mosaic.version = 11 : i64} {
  func.func @conv3x3_act_kernel(%arg0: i32, %arg1: memref<1x18x18x128xbf16, #tpu.memory_space<vmem>>, %arg2: memref<1152x128xbf16, #tpu.memory_space<vmem>>, %arg3: memref<1x128xf32, #tpu.memory_space<vmem>>, %arg4: memref<1x256x128xbf16, #tpu.memory_space<vmem>>) attributes {dimension_semantics = [#tpu.dimension_semantics<parallel>], iteration_bounds = array<i64: 2>, scalar_prefetch = 0 : i64, scratch_operands = 0 : i64, tpu.core_type = #tpu.core_type<tc>, window_params = [{transform_indices = @transform_0, window_bounds = array<i64: 1, 18, 18, 128>}, {pipeline_mode = #tpu.pipeline_mode<synchronous>, transform_indices = @transform_1, window_bounds = array<i64: 1152, 128>}, {pipeline_mode = #tpu.pipeline_mode<synchronous>, transform_indices = @transform_2, window_bounds = array<i64: 1, 128>}, {transform_indices = @transform_3, window_bounds = array<i64: 1, 256, 128>}]} {
    %c0 = arith.constant 0 : index
    %c0_0 = arith.constant 0 : index
    %c0_1 = arith.constant 0 : index
    %c0_2 = arith.constant 0 : index
    %0 = vector.load %arg1[%c0, %c0_0, %c0_1, %c0_2] : memref<1x18x18x128xbf16, #tpu.memory_space<vmem>>, vector<1x18x18x128xbf16>
    %1 = vector.shape_cast %0 : vector<1x18x18x128xbf16> to vector<18x18x128xbf16>
    %2 = vector.extract_strided_slice %1 {offsets = [0, 0, 0], sizes = [16, 16, 128], strides = [1, 1, 1]} : vector<18x18x128xbf16> to vector<16x16x128xbf16>
    %3 = vector.extract_strided_slice %1 {offsets = [0, 1, 0], sizes = [16, 16, 128], strides = [1, 1, 1]} : vector<18x18x128xbf16> to vector<16x16x128xbf16>
    %4 = vector.extract_strided_slice %1 {offsets = [0, 2, 0], sizes = [16, 16, 128], strides = [1, 1, 1]} : vector<18x18x128xbf16> to vector<16x16x128xbf16>
    %5 = vector.extract_strided_slice %1 {offsets = [1, 0, 0], sizes = [16, 16, 128], strides = [1, 1, 1]} : vector<18x18x128xbf16> to vector<16x16x128xbf16>
    %6 = vector.extract_strided_slice %1 {offsets = [1, 1, 0], sizes = [16, 16, 128], strides = [1, 1, 1]} : vector<18x18x128xbf16> to vector<16x16x128xbf16>
    %7 = vector.extract_strided_slice %1 {offsets = [1, 2, 0], sizes = [16, 16, 128], strides = [1, 1, 1]} : vector<18x18x128xbf16> to vector<16x16x128xbf16>
    %8 = vector.extract_strided_slice %1 {offsets = [2, 0, 0], sizes = [16, 16, 128], strides = [1, 1, 1]} : vector<18x18x128xbf16> to vector<16x16x128xbf16>
    %9 = vector.extract_strided_slice %1 {offsets = [2, 1, 0], sizes = [16, 16, 128], strides = [1, 1, 1]} : vector<18x18x128xbf16> to vector<16x16x128xbf16>
    %10 = vector.extract_strided_slice %1 {offsets = [2, 2, 0], sizes = [16, 16, 128], strides = [1, 1, 1]} : vector<18x18x128xbf16> to vector<16x16x128xbf16>
    %11 = tpu.concatenate %2, %3, %4, %5, %6, %7, %8, %9, %10 in 2 : vector<16x16x128xbf16>, vector<16x16x128xbf16>, vector<16x16x128xbf16>, vector<16x16x128xbf16>, vector<16x16x128xbf16>, vector<16x16x128xbf16>, vector<16x16x128xbf16>, vector<16x16x128xbf16>, vector<16x16x128xbf16> -> vector<16x16x1152xbf16>
    %12 = vector.shape_cast %11 : vector<16x16x1152xbf16> to vector<256x1152xbf16>
    %c0_3 = arith.constant 0 : index
    %c0_4 = arith.constant 0 : index
    %13 = vector.load %arg2[%c0_3, %c0_4] : memref<1152x128xbf16, #tpu.memory_space<vmem>>, vector<1152x128xbf16>
    %cst = arith.constant dense<0.000000e+00> : vector<256x128xf32>
    %14 = tpu.matmul %12, %13, %cst {dimension_numbers = #tpu.dot_dimension_numbers<[1], [0], [0], [1], [0, 0, 1, 1], [], []>} : vector<256x1152xbf16>, vector<1152x128xbf16>, vector<256x128xf32> -> vector<256x128xf32>
    %c0_5 = arith.constant 0 : index
    %c0_6 = arith.constant 0 : index
    %15 = vector.load %arg3[%c0_5, %c0_6] : memref<1x128xf32, #tpu.memory_space<vmem>>, vector<1x128xf32>
    %16 = vector.broadcast %15 : vector<1x128xf32> to vector<256x128xf32>
    %17 = arith.addf %14, %16 : vector<256x128xf32>
    %cst_7 = arith.constant 0.000000e+00 : f32
    %18 = vector.broadcast %cst_7 : f32 to vector<256x128xf32>
    %19 = arith.maximumf %17, %18 : vector<256x128xf32>
    %20 = arith.truncf %19 : vector<256x128xf32> to vector<256x128xbf16>
    %c0_8 = arith.constant 0 : index
    %c0_9 = arith.constant 0 : index
    %c0_10 = arith.constant 0 : index
    %21 = vector.load %arg4[%c0_8, %c0_9, %c0_10] : memref<1x256x128xbf16, #tpu.memory_space<vmem>>, vector<1x256x128xbf16>
    %22 = vector.shape_cast %21 : vector<1x256x128xbf16> to vector<256x128xbf16>
    %23 = vector.shape_cast %20 : vector<256x128xbf16> to vector<1x256x128xbf16>
    tpu.vector_store %arg4[%c0_8, %c0_9, %c0_10], %23 {strides = array<i32>} : memref<1x256x128xbf16, #tpu.memory_space<vmem>>, vector<1x256x128xbf16>,
    return
  }
  func.func @transform_0(%arg0: i32) -> (i32, i32, i32, i32) {
    %c0_i32 = arith.constant 0 : i32
    %c0_i32_0 = arith.constant 0 : i32
    %c0_i32_1 = arith.constant 0 : i32
    %c0_i32_2 = arith.constant 0 : i32
    return %arg0, %c0_i32, %c0_i32_0, %c0_i32_1 : i32, i32, i32, i32
  }
  func.func @transform_1(%arg0: i32) -> (i32, i32) {
    %c0_i32 = arith.constant 0 : i32
    %c0_i32_0 = arith.constant 0 : i32
    %c0_i32_1 = arith.constant 0 : i32
    return %c0_i32, %c0_i32_0 : i32, i32
  }
  func.func @transform_2(%arg0: i32) -> (i32, i32) {
    %c0_i32 = arith.constant 0 : i32
    %c0_i32_0 = arith.constant 0 : i32
    %c0_i32_1 = arith.constant 0 : i32
    return %c0_i32, %c0_i32_0 : i32, i32
  }
  func.func @transform_3(%arg0: i32) -> (i32, i32, i32) {
    %c0_i32 = arith.constant 0 : i32
    %c0_i32_0 = arith.constant 0 : i32
    %c0_i32_1 = arith.constant 0 : i32
    return %arg0, %c0_i32, %c0_i32_0 : i32, i32, i32
  }
}

</mosaic_0001>

<bundles_post_ra>
// kernel: tpu_custom_call.1
= control target key start
LH: loop header
LB: loop body
LE: loop exit
PB: predicated region body
PF: predicated region fallthrough
CT: control target
= control target key end

     0   :  { %8 = vsyncpa [#allocation3], 0  ;;  %s4632_s0 = inlined_call_operand.vmem [shape: bf16[2,18,18,128], index: 0, kind: input, shape index: {}]   ;;  %s4633_s1 = inlined_call_operand.vmem [shape: bf16[1152,128], index: 1, kind: input, shape index: {}]   ;;  %s4634_s2 = inlined_call_operand.vmem [shape: f32[1,128], index: 2, kind: input, shape index: {}]   ;;  %s4635_s3 = inlined_call_operand.hbm [shape: bf16[2,256,128], index: 3, kind: output, shape index: {}]  }
   0x1   :  { %10 = vsyncpa [#allocation3 + $0x1], 0  ;;  %s3406_s12 = smov 0   ;;  %s3408_s13 = smov 0  }
   0x2   :  { %s3410_s14 = smov 0   ;;  %s3412_s15 = smov 0  }
   0x3 LB: > { %s3427_s16 = sadd.s32 4294967295, %s3381_s15   ;;  %s2350_s17 = sadd.s32 4294967294, %s3381_s15   ;;  %s3381_s15 = sphi %s3412_s15, %s4663_s15   ;;  %s3377_s14 = sphi %s3410_s14, %s4662_s14   ;;  %s3373_s13 = sphi %s3408_s13, %s4661_s13   ;;  %s3369_s12 = sphi %s3406_s12, %s4660_s12  }
   0x4   : > { %s3431_s18 = sadd.s32 1, %s3381_s15   ;;  %s91_s19 = sadd.s32 1, %s3377_s14 }
   0x5   : > { %s88_s20 = ssub.s32 %s3381_s15, %s3431_s18  ;;  %p101_p0 = scmp.ne.s32.totalorder %s3377_s14, %s3373_s13 }
   0x6   : > { %p89_p1 = scmp.eq.s32.totalorder %s88_s20, 0  ;;  %p102_p2 = scmp.eq.s32.totalorder %s3427_s16, 1 }
   0x7   : > { %p107_p3 = scmp.ne.s32.totalorder %s3373_s13, %s3369_s12  ;;  %p108_p4 = scmp.eq.s32.totalorder %s2350_s17, 1 }
   0x8   : > { %s3442_s21 = scalar_select %p89_p1, %s3377_s14, %s91_s19  }
   0x9   : > { %p3444_p5 = por %p102_p2, %p101_p0  ;;  %p3448_p6 = por %p108_p4, %p107_p3 }
   0xa   : > { %p2353_p7 = scmp.ge.s32.totalorder %s3381_s15, 1  ;;  %p140_p8 = scmp.lt.s32.totalorder %s3381_s15, 3 }
   0xc   : > { %p141_p9 = pnand %p2353_p7, %p140_p8 }
   0xe   : > { %144 = sbr.rel (%p141_p9) target bundleno = 555 (0x22b), region = 32 }
  0x13   : > { %v3208_v0 = vld [vmem:[%s4633_s1 + $0x78] sm:$0xff]   ;;  %v3210_v2 = vld [vmem:[%s4633_s1 + $0x70] sm:$0xff]   ;;  %p164_p10 = scmp.lt.s32.totalorder %s3427_s16, 1  ;;  %v3212_v4 = vld [vmem:[%s4633_s1 + $0x68] sm:$0xff]   ;;  %vm368_vm0 = vsmask.f32 7424 }
  0x14   : > { %v3209_v1 = vld [vmem:[%s4633_s1 + $0x38] sm:$0xff]   ;;  %2630 = vmatprep.subr.bf16.mxu0 %v3208_v0  ;;  %3150 = vmatprep.subr.bf16.mxu1 %v3208_v0  ;;  %v3211_v3 = vld [vmem:[%s4633_s1 + $0x30] sm:$0xff]   ;;  %v3213_v5 = vld [vmem:[%s4633_s1 + $0x28] sm:$0xff]   ;;  %vm577_vm1 = vcmask 1046528   ;;  %s2534_s19 = sshll.u32 %s3427_s16, 11  ;;  %s3383_s28 = smov [#allocation2]  }
  0x15   : > { %2631 = vmatpush3.bf16.msra.mxu0 %v3209_v1  ;;  %3158 = vmatpush3.bf16.msra.mxu1 %v3209_v1  ;;  %s165_s7 = scalar_select %p164_p10, %s3427_s16, 1  ;;  %v3214_v6 = vld [vmem:[%s4633_s1 + $0x60] sm:$0xff]   ;;  %v3216_v8 = vld [vmem:[%s4633_s1 + $0x58] sm:$0xff]   ;;  %v3218_v10 = vld [vmem:[%s4633_s1 + $0x50] sm:$0xff]  }
  0x16   : > { %2632 = vmatprep.subr.bf16.mxu0 %v3210_v2  ;;  %3151 = vmatprep.subr.bf16.mxu1 %v3210_v2  ;;  %v3215_v7 = vld [vmem:[%s4633_s1 + $0x20] sm:$0xff]   ;;  %v3217_v9 = vld [vmem:[%s4633_s1 + $0x18] sm:$0xff]   ;;  %v3219_v11 = vld [vmem:[%s4633_s1 + $0x10] sm:$0xff]   ;;  %s4585_s26 = scalar_lea.hbm %s4635_s3, %s2534_s19  ;;  %s3325_s29 = sshll.u32 %s3383_s28, 4  ;;  %s3326_s29 = int_to_ptr.vmem [resolvable:$false] %s3325_s29 }
  0x17   : > { %s3166_s17 = smul.u32 216, %s165_s7  ;;  %v3220_v18 = vld [vmem:[%s4633_s1 + $0x48] sm:$0xff]   ;;  %v3222_v28 = vld [vmem:[%s4633_s1 + $0x40] sm:$0xff]   ;;  %v3228_v33 = vld [vmem:[%s4633_s1 + $0xf8] sm:$0xff]   ;;  %s3327_s4 = scalar_lea.vmem %s3326_s29, 4096 }
  0x18   : > { %v3221_v25 = vld [vmem:[%s4633_s1 + $0x8] sm:$0xff]   ;;  %v3223_v30 = vld [vmem:[%s4633_s1] sm:$0xff]   ;;  %v3231_v34 = vld [vmem:[%s4633_s1 + $0x178] sm:$0xff]  }
  0x19   : > { %2633 = vmatpush3.bf16.msra.mxu0 %v3211_v3  ;;  %3159 = vmatpush3.bf16.msra.mxu1 %v3211_v3  ;;  %s3489_s30 = scalar_lea.vmem %s4632_s0, %s3166_s17  ;;  %v3229_v39 = vld [vmem:[%s4633_s1 + $0xb8] sm:$0xff]   ;;  %v3230_v48 = vld [vmem:[%s4633_s1 + $0xf0] sm:$0xff]   ;;  %v3238_v57 = vld [vmem:[%s4633_s1 + $0xe8] sm:$0xff]  }
  0x1a   : > { %2634 = vmatprep.subr.bf16.mxu0 %v3212_v4  ;;  %3152 = vmatprep.subr.bf16.mxu1 %v3212_v4  ;;  %v3498_v12 = vld [vmem:[%s3489_s30] sm:$0xff]   ;;  %v3501_v13 = vld [vmem:[%s3489_s30 + $0x8] ss:$0 sps:$4 sm:$0x11]   ;;  %v3226_v17 = vld [vmem:[%s3489_s30 + $0x90] sm:$0xff]  }
  0x1b   : > { %v370_v14 = vshrl.u32 %v3498_v12, 16  ;;  %v372_v15 = vshll.u32 %v3498_v12, 16  ;;  %v377_v16 = vshll.u32 %v3501_v13, 16  ;;  %v3227_v19 = vld [vmem:[%s3489_s30 + $0x98] ss:$0 sps:$4 sm:$0x11]  }
  0x1c   : > { %v514_v22 = vshrl.u32 %v3226_v17, 16  ;;  %v516_v23 = vshll.u32 %v3226_v17, 16  ;;  %v521_v24 = vshll.u32 %v3227_v19, 16  ;;  %v3531_v36 = vld [vmem:[%s3489_s30 + $0xc] sm:$0xff]   ;;  %v3537_v38 = vld [vmem:[%s3489_s30 + $0x9c] sm:$0xff]  }
  0x1d   : > { %2635 = vmatpush3.bf16.msra.mxu0 %v3213_v5  ;;  %3160 = vmatpush3.bf16.msra.mxu1 %v3213_v5  ;;  %v374_v20 = vrot.slane %v372_v15, 1  ;;  %v379_v21 = vrot.slane %v377_v16, 1  ;;  %v3534_v37 = vld [vmem:[%s3489_s30 + $0x14] ss:$0 sps:$4 sm:$0x11]   ;;  %v382_v40 = vshrl.u32 %v3531_v36, 16 }
  0x1e   : > { %2636 = vmatprep.subr.bf16.mxu0 %v3214_v6  ;;  %3153 = vmatprep.subr.bf16.mxu1 %v3214_v6  ;;  %v518_v27 = vrot.slane %v516_v23, 1  ;;  %v523_v29 = vrot.slane %v521_v24, 1  ;;  %v384_v41 = vshll.u32 %v3531_v36, 16  ;;  %v389_v42 = vshll.u32 %v3534_v37, 16  ;;  %v3233_v46 = vld [vmem:[%s4633_s1 + $0x138] sm:$0xff]   ;;  %v3232_v53 = vld [vmem:[%s4633_s1 + $0xb0] sm:$0xff]  }
  0x1f   : > { %v375_v26 = vor.u32 %v374_v20, %v370_v14  ;;  %v3547_v43 = vld [vmem:[%s3489_s30 + $0xa4] ss:$0 sps:$4 sm:$0x11]   ;;  %v526_v44 = vshrl.u32 %v3537_v38, 16  ;;  %v528_v45 = vshll.u32 %v3537_v38, 16  ;;  %v3573_v59 = vld [vmem:[%s3489_s30 + $0x18] sm:$0xff]  }
  0x20   : > { %v519_v32 = vor.u32 %v518_v27, %v514_v22  ;;  %v386_v47 = vrot.slane %v384_v41, 1  ;;  %v391_v49 = vrot.slane %v389_v42, 1  ;;  %v533_v51 = vshll.u32 %v3547_v43, 16  ;;  %v3576_v60 = vld [vmem:[%s3489_s30 + $0x20] ss:$0 sps:$4 sm:$0x11]  }
  0x21   : > { %2637 = vmatpush3.bf16.msra.mxu0 %v3215_v7  ;;  %3161 = vmatpush3.bf16.msra.mxu1 %v3215_v7  ;;  %v380_v31 = vsel %vm368_vm0, %v375_v26, %v379_v21  ;;  %v530_v50 = vrot.slane %v528_v45, 1  ;;  %v3239_v61 = vld [vmem:[%s4633_s1 + $0xa8] sm:$0xff]   ;;  %v394_v62 = vshrl.u32 %v3573_v59, 16  ;;  %v396_v63 = vshll.u32 %v3573_v59, 16  ;;  %v3240_v2 = vld [vmem:[%s4633_s1 + $0xe0] sm:$0xff]   ;;  %v3249_v16 = vld [vmem:[%s4633_s1 + $0x130] sm:$0xff]  }
  0x22   : > { %2638 = vmatprep.subr.bf16.mxu0 %v3216_v8  ;;  %3154 = vmatprep.subr.bf16.mxu1 %v3216_v8  ;;  %v3528_v35 = vsel %vm368_vm0, %v519_v32, %v523_v29  ;;  %v387_v52 = vor.u32 %v386_v47, %v382_v40  ;;  %v535_v55 = vrot.slane %v533_v51, 1  ;;  %v401_v0 = vshll.u32 %v3576_v60, 16  ;;  %v3586_v1 = vld [vmem:[%s3489_s30 + $0xa8] sm:$0xff]   ;;  %v3592_v3 = vld [vmem:[%s3489_s30 + $0xb0] ss:$0 sps:$4 sm:$0x11]  }
  0x23   : > { %1309 = vmatprep.mubr.bf16.mxu0 %v380_v31  ;;  %1405 = vmatprep.mubr.bf16.mxu1 %v3528_v35  ;;  %v531_v54 = vor.u32 %v530_v50, %v526_v44  ;;  %v398_v4 = vrot.slane %v396_v63, 1  ;;  %v538_v6 = vshrl.u32 %v3586_v1, 16  ;;  %v540_v7 = vshll.u32 %v3586_v1, 16  ;;  %v3246_v19 = vld [vmem:[%s4633_s1 + $0xd8] sm:$0xff]   ;;  %v3250_v22 = vld [vmem:[%s4633_s1 + $0xd0] sm:$0xff]   ;;  %v3625_v23 = vld [vmem:[%s3489_s30 + $0x24] sm:$0xff]  }
  0x24   : > { %v3563_v56 = vsel %vm368_vm0, %v387_v52, %v391_v49  ;;  %v403_v5 = vrot.slane %v401_v0, 1  ;;  %v545_v8 = vshll.u32 %v3592_v3, 16  ;;  %v3248_v20 = vld [vmem:[%s4633_s1 + $0x98] sm:$0xff]   ;;  %v3629_v24 = vld [vmem:[%s3489_s30 + $0x2c] ss:$0 sps:$4 sm:$0x11]  }
  0x25   : > { %2639 = vmatpush3.bf16.msra.mxu0 %v3217_v9  ;;  %3162 = vmatpush3.bf16.msra.mxu1 %v3217_v9  ;;  %v3570_v58 = vsel %vm368_vm0, %v531_v54, %v535_v55  ;;  %v3247_v9 = vld [vmem:[%s4633_s1 + $0x170] sm:$0xff]   ;;  %v542_v14 = vrot.slane %v540_v7, 1  ;;  %v406_v26 = vshrl.u32 %v3625_v23, 16  ;;  %v408_v27 = vshll.u32 %v3625_v23, 16  ;;  %v3256_v41 = vld [vmem:[%s4633_s1 + $0xc8] sm:$0xff]   ;;  %v3258_v51 = vld [vmem:[%s4633_s1 + $0xc0] sm:$0xff]  }
  0x26   : > { %2640 = vmatprep.subr.bf16.mxu0 %v3218_v10  ;;  %3155 = vmatprep.subr.bf16.mxu1 %v3218_v10  ;;  %v3241_v10 = vld [vmem:[%s4633_s1 + $0xa0] sm:$0xff]   ;;  %v547_v15 = vrot.slane %v545_v8, 1  ;;  %v3638_v29 = vld [vmem:[%s3489_s30 + $0xbc] ss:$0 sps:$4 sm:$0x11]   ;;  %v3251_v32 = vld [vmem:[%s4633_s1 + $0x90] sm:$0xff]  }
  0x27   : > { %v557_v40 = vshll.u32 %v3638_v29, 16  ;;  %v579_v47 = vrot.slane %v3501_v13, 1  ;;  %v3259_v49 = vld [vmem:[%s4633_s1 + $0x168] sm:$0xff]   ;;  %v578_v52 = vrot.slane %v3498_v12, 1  ;;  %v3675_v54 = vld [vmem:[%s3489_s30 + $0x30] sm:$0xff]   ;;  %v3264_v0 = vld [vmem:[%s4633_s1 + $0x1f8] sm:$0xff]  }
  0x28   : > { %v3261_v13 = vld [vmem:[%s4633_s1 + $0x128] sm:$0xff]   ;;  %v3678_v55 = vld [vmem:[%s3489_s30 + $0x38] ss:$0 sps:$4 sm:$0x11]   ;;  %v3269_v8 = vld [vmem:[%s4633_s1 + $0x120] sm:$0xff]  }
  0x29   : > { %2641 = vmatpush3.bf16.msra.mxu0 %v3219_v11  ;;  %3163 = vmatpush3.bf16.msra.mxu1 %v3219_v11  ;;  %v399_v11 = vor.u32 %v398_v4, %v394_v62  ;;  %v559_v45 = vrot.slane %v557_v40, 1  ;;  %v420_v62 = vshll.u32 %v3675_v54, 16  ;;  %v425_v63 = vshll.u32 %v3678_v55, 16  ;;  %v3703_v7 = vld [vmem:[%s3489_s30 + $0x44] ss:$0 sps:$4 sm:$0x11]  }
  0x2a   : > { %2642 = vmatprep.subr.bf16.mxu0 %v3220_v18  ;;  %3156 = vmatprep.subr.bf16.mxu1 %v3220_v18  ;;  %v543_v18 = vor.u32 %v542_v14, %v538_v6  ;;  %v3268_v6 = vld [vmem:[%s4633_s1 + $0x160] sm:$0xff]   ;;  %v437_v14 = vshll.u32 %v3703_v7, 16 }
  0x2b   : > { %v427_v4 = vrot.slane %v425_v63, 1 }
  0x2c   : > { %v3619_v21 = vsel %vm368_vm0, %v543_v18, %v547_v15  ;;  %v3713_v15 = vld [vmem:[%s3489_s30 + $0x48] sm:$0xff]  }
  0x2d   : > { %2643 = vmatpush3.bf16.msra.mxu0 %v3221_v25  ;;  %3164 = vmatpush3.bf16.msra.mxu1 %v3221_v25  ;;  %v3632_v25 = vld [vmem:[%s3489_s30 + $0xb4] sm:$0xff]  }
  0x2e   : > { %2644 = vmatprep.subr.bf16.mxu0 %v3222_v28  ;;  %3157 = vmatprep.subr.bf16.mxu1 %v3222_v28  ;;  %v413_v28 = vshll.u32 %v3629_v24, 16  ;;  %v552_v31 = vshll.u32 %v3632_v25, 16 }
  0x31   : > { %2645 = vmatpush3.bf16.msra.mxu0 %v3223_v30  ;;  %3165 = vmatpush3.bf16.msra.mxu1 %v3223_v30  ;;  %v550_v30 = vshrl.u32 %v3632_v25, 16 }
  0x32   : > { %2742 = vmatprep.subr.bf16.mxu1 %v3228_v33  ;;  %2854 = vmatprep.subr.bf16.mxu0 %v3231_v34  ;;  %v410_v33 = vrot.slane %v408_v27, 1  ;;  %v415_v34 = vrot.slane %v413_v28, 1  ;;  %v444_v27 = vshll.u32 %v3713_v15, 16 }
  0x34   : > { %1310 = vmatmul.mubr.bf16.vlgmr.msra.gmra.mxu0 %v3498_v12  ;;  %1406 = vmatmul.mubr.bf16.vlgmr.msra.gmra.mxu1 %v3226_v17  ;;  %v3609_v17 = vsel %vm368_vm0, %v399_v11, %v403_v5  ;;  %v411_v42 = vor.u32 %v410_v33, %v406_v26  ;;  %v3260_v12 = vld [vmem:[%s4633_s1 + $0x80] sm:$0xff]   ;;  %v442_v26 = vshrl.u32 %v3713_v15, 16  ;;  %v3274_v33 = vld [vmem:[%s4633_s1 + $0x158] sm:$0xff]  }
  0x35   : > { %2743 = vmatpush3.bf16.msra.mxu1 %v3229_v39  ;;  %2855 = vmatpush3.bf16.msra.mxu0 %v3233_v46  ;;  %v554_v39 = vrot.slane %v552_v31, 1  ;;  %v3257_v46 = vld [vmem:[%s4633_s1 + $0x88] sm:$0xff]   ;;  %v3697_v5 = vld [vmem:[%s3489_s30 + $0x3c] sm:$0xff]  }
  0x36   : > { %2744 = vmatprep.subr.bf16.mxu1 %v3230_v48  ;;  %1317 = vmatprep.mubr.bf16.mxu0 %v3563_v56  ;;  %v3656_v48 = vsel %vm368_vm0, %v411_v42, %v415_v34  ;;  %v432_v11 = vshll.u32 %v3697_v5, 16 }
  0x37   : > { %1413 = vmatprep.mubr.bf16.mxu1 %v3570_v58  ;;  %2856 = vmatprep.subr.bf16.mxu0 %v3247_v9  ;;  %v555_v44 = vor.u32 %v554_v39, %v550_v30  ;;  %v580_v9 = vsel %vm577_vm1, %v578_v52, %v579_v47  ;;  %v446_v30 = vrot.slane %v444_v27, 1  ;;  %v584_v52 = vrot.slane %v3573_v59, 1 }
  0x38   : > { %v434_v18 = vrot.slane %v432_v11, 1  ;;  %v3795_v11 = vld [vmem:[%s3489_s30 + $0x74] ss:$0 sps:$4 sm:$0x11]  }
  0x39   : > { %2745 = vmatpush3.bf16.msra.mxu1 %v3232_v53  ;;  %2857 = vmatpush3.bf16.msra.mxu0 %v3249_v16  ;;  %v3663_v50 = vsel %vm368_vm0, %v555_v44, %v559_v45  ;;  %v581_v53 = vrot.slane %v3531_v36, 1  ;;  %v447_v39 = vor.u32 %v446_v30, %v442_v26  ;;  %v3747_v44 = vld [vmem:[%s3489_s30 + $0x54] sm:$0xff]   ;;  %v3750_v45 = vld [vmem:[%s3489_s30 + $0x5c] ss:$0 sps:$4 sm:$0x11]   ;;  %v3290_v30 = vld [vmem:[%s4633_s1 + $0x1e0] sm:$0xff]  }
  0x3a   : > { %2746 = vmatprep.subr.bf16.mxu1 %v3238_v57  ;;  %2858 = vmatprep.subr.bf16.mxu0 %v3259_v49  ;;  %v582_v57 = vrot.slane %v3534_v37, 1  ;;  %v3265_v37 = vld [vmem:[%s4633_s1 + $0x1b8] sm:$0xff]   ;;  %v454_v49 = vshrl.u32 %v3747_v44, 16 }
  0x3c   : > { %1318 = vmatmul.mubr.bf16.gmra.mxu0 %v3531_v36  ;;  %1414 = vmatmul.mubr.bf16.gmra.mxu1 %v3537_v38  ;;  %v3744_v42 = vsel %vm577_vm1, %v581_v53, %v582_v57  ;;  %v461_v53 = vshll.u32 %v3750_v45, 16 }
  0x3d   : > { %2747 = vmatpush3.bf16.msra.mxu1 %v3239_v61  ;;  %1325 = vmatprep.mubr.bf16.mxu0 %v3609_v17  ;;  %v418_v61 = vshrl.u32 %v3675_v54, 16 }
  0x3e   : > { %2748 = vmatprep.subr.bf16.mxu1 %v3240_v2  ;;  %1421 = vmatprep.mubr.bf16.mxu1 %v3619_v21  ;;  %v422_v2 = vrot.slane %v420_v62, 1  ;;  %v3280_v62 = vld [vmem:[%s4633_s1 + $0x150] sm:$0xff]   ;;  %v463_v63 = vrot.slane %v461_v53, 1  ;;  %v3837_v53 = vld [vmem:[%s3489_s30 + $0x80] ss:$0 sps:$4 sm:$0x11]  }
  0x3f   : > { %2859 = vmatpush3.bf16.msra.mxu0 %v3261_v13  ;;  %v585_v13 = vrot.slane %v3576_v60, 1 }
  0x40   : > { %2860 = vmatprep.subr.bf16.mxu0 %v3268_v6 }
  0x41   : > { %2749 = vmatpush3.bf16.msra.mxu1 %v3241_v10  ;;  %v430_v10 = vshrl.u32 %v3697_v5, 16 }
  0x42   : > { %2750 = vmatprep.subr.bf16.mxu1 %v3246_v19  ;;  %v3272_v19 = vld [vmem:[%s4633_s1 + $0x1f0] sm:$0xff]  }
  0x43   : > { %2861 = vmatpush3.bf16.msra.mxu0 %v3269_v8  ;;  %v435_v28 = vor.u32 %v434_v18, %v430_v10  ;;  %v3283_v8 = vld [vmem:[%s4633_s1 + $0x1a8] sm:$0xff]   ;;  %v587_v18 = vrot.slane %v3625_v23, 1 }
  0x44   : > { %1326 = vmatmul.mubr.bf16.gmra.mxu0 %v3573_v59  ;;  %1422 = vmatmul.mubr.bf16.gmra.mxu1 %v3586_v1 }
  0x45   : > { %2751 = vmatpush3.bf16.msra.mxu1 %v3248_v20  ;;  %1333 = vmatprep.mubr.bf16.mxu0 %v3656_v48  ;;  %v439_v20 = vrot.slane %v437_v14, 1  ;;  %v3286_v14 = vld [vmem:[%s4633_s1 + $0x148] sm:$0xff]  }
  0x46   : > { %2752 = vmatprep.subr.bf16.mxu1 %v3250_v22  ;;  %1429 = vmatprep.mubr.bf16.mxu1 %v3663_v50  ;;  %v3723_v22 = vld [vmem:[%s3489_s30 + $0x50] ss:$0 sps:$4 sm:$0x11]  }
  0x47   : > { %v449_v31 = vshll.u32 %v3723_v22, 16  ;;  %v3737_v34 = vsel %vm368_vm0, %v435_v28, %v439_v20  ;;  %2862 = vmatprep.subr.bf16.mxu0 %v3274_v33  ;;  %v3287_v20 = vld [vmem:[%s4633_s1 + $0x108] sm:$0xff]  }
  0x49   : > { %2753 = vmatpush3.bf16.msra.mxu1 %v3251_v32  ;;  %v3273_v32 = vld [vmem:[%s4633_s1 + $0x1b0] sm:$0xff]   ;;  %v451_v40 = vrot.slane %v449_v31, 1 }
  0x4a   : > { %2754 = vmatprep.subr.bf16.mxu1 %v3256_v41  ;;  %v3275_v41 = vld [vmem:[%s4633_s1 + $0x118] sm:$0xff]  }
  0x4b   : > { %2863 = vmatpush3.bf16.msra.mxu0 %v3275_v41  ;;  %v3756_v47 = vsel %vm368_vm0, %v447_v39, %v451_v40  ;;  %v3825_v41 = vld [vmem:[%s3489_s30 + $0x78] sm:$0xff]  }
  0x4c   : > { %1334 = vmatmul.mubr.bf16.gmra.mxu0 %v3625_v23  ;;  %1430 = vmatmul.mubr.bf16.gmra.mxu1 %v3632_v25 }
  0x4d   : > { %2755 = vmatpush3.bf16.msra.mxu1 %v3257_v46  ;;  %1470 = vmatprep.mubr.bf16.mxu1 %v3531_v36  ;;  %v423_v36 = vor.u32 %v422_v2, %v418_v61  ;;  %v3753_v46 = vld [vmem:[%s3489_s30 + $0x60] sm:$0xff]   ;;  %v3769_v61 = vld [vmem:[%s3489_s30 + $0x68] ss:$0 sps:$4 sm:$0x11]  }
  0x4e   : > { %2756 = vmatprep.subr.bf16.mxu1 %v3258_v51  ;;  %v456_v51 = vshll.u32 %v3747_v44, 16  ;;  %v468_v57 = vshll.u32 %v3753_v46, 16  ;;  %v466_v2 = vshrl.u32 %v3753_v46, 16  ;;  %2864 = vmatprep.subr.bf16.mxu0 %v3280_v62  ;;  %v492_v62 = vshll.u32 %v3825_v41, 16 }
  0x4f   : > { %v3716_v16 = vsel %vm368_vm0, %v423_v36, %v427_v4  ;;  %v3282_v4 = vld [vmem:[%s4633_s1 + $0x110] sm:$0xff]   ;;  %v473_v36 = vshll.u32 %v3769_v61, 16 }
  0x50   : > { %1341 = vmatprep.mubr.bf16.mxu0 %v3716_v16  ;;  %v470_v6 = vrot.slane %v468_v57, 1  ;;  %2865 = vmatpush3.bf16.msra.mxu0 %v3282_v4  ;;  %v497_v4 = vshll.u32 %v3837_v53, 16 }
  0x51   : > { %2757 = vmatpush3.bf16.msra.mxu1 %v3260_v12  ;;  %v458_v12 = vrot.slane %v456_v51, 1  ;;  %2866 = vmatprep.subr.bf16.mxu0 %v3286_v14  ;;  %v475_v27 = vrot.slane %v473_v36, 1  ;;  %v3294_v51 = vld [vmem:[%s4633_s1 + $0x140] sm:$0xff]   ;;  %v494_v36 = vrot.slane %v492_v62, 1  ;;  %v3299_v14 = vld [vmem:[%s4633_s1 + $0x1d0] sm:$0xff]  }
  0x52   : > { %2966 = vmatprep.subr.bf16.mxu1 %v3264_v0  ;;  %v3281_v0 = vld [vmem:[%s4633_s1 + $0x1e8] sm:$0xff]   ;;  %v471_v26 = vor.u32 %v470_v6, %v466_v2  ;;  %v3856_v2 = vld [vmem:[%s4633_s1 + $0x238] sm:$0xff]  }
  0x53   : > { %v459_v60 = vor.u32 %v458_v12, %v454_v49  ;;  %v590_v49 = vrot.slane %v3675_v54, 1  ;;  %v3295_v12 = vld [vmem:[%s4633_s1 + $0x100] sm:$0xff]  }
  0x54   : > { %1471 = vmatmul.mubr.bf16.vlgmr.msra.gmra.mxu1 %v580_v9  ;;  %1342 = vmatmul.mubr.bf16.gmra.mxu0 %v3675_v54  ;;  %v3789_v9 = vld [vmem:[%s3489_s30 + $0x6c] sm:$0xff]   ;;  %v3821_v33 = vsel %vm368_vm0, %v471_v26, %v475_v27  ;;  %v3860_v6 = vld [vmem:[%s3489_s30 + $0x84] sm:$0xff]   ;;  %v594_v26 = vrot.slane %v3703_v7, 1  ;;  %v499_v27 = vrot.slane %v497_v4, 1  ;;  %v599_v4 = vrot.slane %v3747_v44, 1 }
  0x55   : > { %2967 = vmatpush3.bf16.msra.mxu1 %v3265_v37  ;;  %1478 = vmatprep.mubr.bf16.mxu1 %v3573_v59  ;;  %v3782_v37 = vsel %vm577_vm1, %v584_v52, %v585_v13  ;;  %v3792_v10 = vsel %vm368_vm0, %v459_v60, %v463_v63  ;;  %v480_v28 = vshll.u32 %v3789_v9, 16  ;;  %v478_v39 = vshrl.u32 %v3789_v9, 16  ;;  %v3296_v60 = vld [vmem:[%s4633_s1 + $0x1d8] sm:$0xff]   ;;  %v3305_v7 = vld [vmem:[%s4633_s1 + $0x1c0] sm:$0xff]  }
  0x56   : > { %2968 = vmatprep.subr.bf16.mxu1 %v3272_v19  ;;  %1349 = vmatprep.mubr.bf16.mxu0 %v3737_v34  ;;  %v588_v19 = vrot.slane %v3629_v24, 1  ;;  %v485_v24 = vshll.u32 %v3795_v11, 16  ;;  %v591_v52 = vrot.slane %v3678_v55, 1  ;;  %v3297_v55 = vld [vmem:[%s4633_s1 + $0x198] sm:$0xff]  }
  0x57   : > { %2867 = vmatpush3.bf16.msra.mxu0 %v3287_v20  ;;  %v482_v40 = vrot.slane %v480_v28, 1  ;;  %v593_v20 = vrot.slane %v3697_v5, 1  ;;  %v3302_v28 = vld [vmem:[%s4633_s1 + $0x1c8] sm:$0xff]  }
  0x58   : > { %v3814_v31 = vsel %vm577_vm1, %v587_v18, %v588_v19  ;;  %v487_v13 = vrot.slane %v485_v24, 1  ;;  %2868 = vmatprep.subr.bf16.mxu0 %v3294_v51  ;;  %v3850_v63 = vsel %vm577_vm1, %v590_v49, %v591_v52  ;;  %v3871_v18 = vld [vmem:[%s3489_s30 + $0x8c] ss:$0 sps:$4 sm:$0x11]   ;;  %v3300_v19 = vld [vmem:[%s4633_s1 + $0x190] sm:$0xff]   ;;  %v504_v24 = vshll.u32 %v3860_v6, 16 }
  0x59   : > { %2969 = vmatpush3.bf16.msra.mxu1 %v3273_v32  ;;  %v3291_v32 = vld [vmem:[%s4633_s1 + $0x1a0] sm:$0xff]   ;;  %v483_v57 = vor.u32 %v482_v40, %v478_v39  ;;  %v3889_v39 = vsel %vm577_vm1, %v593_v20, %v594_v26  ;;  %v502_v40 = vshrl.u32 %v3860_v6, 16  ;;  %v509_v49 = vshll.u32 %v3871_v18, 16 }
  0x5a   : > { %2970 = vmatprep.subr.bf16.mxu1 %v3281_v0  ;;  %v490_v0 = vshrl.u32 %v3825_v41, 16  ;;  %v506_v52 = vrot.slane %v504_v24, 1  ;;  %v605_v26 = vrot.slane %v3789_v9, 1  ;;  %v3310_v24 = vld [vmem:[%s4633_s1 + $0x210] sm:$0xff]  }
  0x5b   : > { %2869 = vmatpush3.bf16.msra.mxu0 %v3295_v12  ;;  %v596_v12 = vrot.slane %v3713_v15, 1 }
  0x5c   : > { %1479 = vmatmul.mubr.bf16.gmra.mxu1 %v3744_v42  ;;  %1350 = vmatmul.mubr.bf16.gmra.mxu0 %v3697_v5  ;;  %v507_v62 = vor.u32 %v506_v52, %v502_v40  ;;  %v3311_v40 = vld [vmem:[%s4633_s1 + $0x208] sm:$0xff]   ;;  %v3312_v52 = vld [vmem:[%s4633_s1 + $0x200] sm:$0xff]  }
  0x5d   : > { %1486 = vmatprep.mubr.bf16.mxu1 %v3625_v23  ;;  %1357 = vmatprep.mubr.bf16.mxu0 %v3756_v47 }
  0x5e   : > { %2971 = vmatpush3.bf16.msra.mxu1 %v3283_v8  ;;  %v3863_v8 = vsel %vm368_vm0, %v483_v57, %v487_v13  ;;  %3102 = vmatprep.subr.bf16.mxu0 %v3856_v2  ;;  %v3306_v13 = vld [vmem:[%s4633_s1 + $0x180] sm:$0xff]   ;;  %v597_v57 = vrot.slane %v3723_v22, 1  ;;  %v600_v22 = vrot.slane %v3750_v45, 1  ;;  %v3301_v45 = vld [vmem:[%s4633_s1 + $0x230] sm:$0xff]  }
  0x5f   : > { %2972 = vmatprep.subr.bf16.mxu1 %v3290_v30  ;;  %v495_v30 = vor.u32 %v494_v36, %v490_v0 }
  0x60   : > { %v3921_v36 = vsel %vm577_vm1, %v599_v4, %v600_v22  ;;  %v620_v22 = vrot.slane %v3586_v1, 1 }
  0x61   : > { %v3897_v51 = vsel %vm368_vm0, %v495_v30, %v499_v27  ;;  %v606_v27 = vrot.slane %v3795_v11, 1  ;;  %v608_v11 = vrot.slane %v3825_v41, 1 }
  0x62   : > { %2973 = vmatpush3.bf16.msra.mxu1 %v3291_v32  ;;  %v3303_v32 = vld [vmem:[%s4633_s1 + $0x188] sm:$0xff]  }
  0x63   : > { %2974 = vmatprep.subr.bf16.mxu1 %v3296_v60  ;;  %v511_v60 = vrot.slane %v509_v49, 1 }
  0x64   : > { %1487 = vmatmul.mubr.bf16.gmra.mxu1 %v3782_v37  ;;  %1358 = vmatmul.mubr.bf16.gmra.mxu0 %v3713_v15 }
  0x65   : > { %1494 = vmatprep.mubr.bf16.mxu1 %v3675_v54  ;;  %1365 = vmatprep.mubr.bf16.mxu0 %v3792_v10  ;;  %v3912_v0 = vsel %vm368_vm0, %v507_v62, %v511_v60  ;;  %v617_v62 = vrot.slane %v3537_v38, 1  ;;  %v618_v60 = vrot.slane %v3547_v43, 1  ;;  %v4012_v43 = vld [vmem:[%s3489_s30 + $0xc0] sm:$0xff]  }
  0x66   : > { %2975 = vmatpush3.bf16.msra.mxu1 %v3297_v55  ;;  %v3909_v55 = vsel %vm577_vm1, %v596_v12, %v597_v57 }
  0x67   : > { %2976 = vmatprep.subr.bf16.mxu1 %v3299_v14  ;;  %v602_v14 = vrot.slane %v3753_v46, 1  ;;  %v4000_v4 = vsel %vm577_vm1, %v617_v62, %v618_v60 }
  0x6a   : > { %2977 = vmatpush3.bf16.msra.mxu1 %v3300_v19  ;;  %v603_v19 = vrot.slane %v3769_v61, 1  ;;  %v3946_v61 = vsel %vm577_vm1, %v605_v26, %v606_v27 }
  0x6b   : > { %2978 = vmatprep.subr.bf16.mxu1 %v3302_v28  ;;  %v3309_v28 = vld [vmem:[%s4633_s1 + $0x218] sm:$0xff]  }
  0x6c   : > { %1495 = vmatmul.mubr.bf16.gmra.mxu1 %v3814_v31  ;;  %1366 = vmatmul.mubr.bf16.gmra.mxu0 %v3747_v44  ;;  %v3930_v20 = vsel %vm577_vm1, %v602_v14, %v603_v19  ;;  %v621_v14 = vrot.slane %v3592_v3, 1  ;;  %v623_v19 = vrot.slane %v3632_v25, 1 }
  0x6d   : > { %1502 = vmatprep.mubr.bf16.mxu1 %v3697_v5  ;;  %1373 = vmatprep.mubr.bf16.mxu0 %v3821_v33 }
  0x6e   : > { %2979 = vmatpush3.bf16.msra.mxu1 %v3303_v32  ;;  %v611_v32 = vrot.slane %v3860_v6, 1 }
  0x6f   : > { %2980 = vmatprep.subr.bf16.mxu1 %v3305_v7  ;;  %v612_v7 = vrot.slane %v3871_v18, 1 }
  0x71   : > { %v3979_v49 = vsel %vm577_vm1, %v611_v32, %v612_v7 }
  0x72   : > { %2981 = vmatpush3.bf16.msra.mxu1 %v3306_v13  ;;  %v3317_v13 = vld [vmem:[%s3489_s30 + $0x98] ss:$0 sps:$4 sm:$0x11]  }
  0x73   : > { %v615_v12 = vrot.slane %v3317_v13, 1 }
  0x74   : > { %1503 = vmatmul.mubr.bf16.gmra.mxu1 %v3850_v63  ;;  %1374 = vmatmul.mubr.bf16.gmra.mxu0 %v3753_v46 }
  0x75   : > { %1510 = vmatprep.mubr.bf16.mxu1 %v3713_v15  ;;  %1381 = vmatprep.mubr.bf16.mxu0 %v3863_v8 }
  0x7c   : > { %1511 = vmatmul.mubr.bf16.gmra.mxu1 %v3889_v39  ;;  %1382 = vmatmul.mubr.bf16.gmra.mxu0 %v3789_v9 }
  0x7d   : > { %1518 = vmatprep.mubr.bf16.mxu1 %v3747_v44  ;;  %1389 = vmatprep.mubr.bf16.mxu0 %v3897_v51 }
  0x84   : > { %1519 = vmatmul.mubr.bf16.gmra.mxu1 %v3909_v55  ;;  %1390 = vmatmul.mubr.bf16.gmra.mxu0 %v3825_v41 }
  0x85   : > { %1526 = vmatprep.mubr.bf16.mxu1 %v3753_v46  ;;  %1397 = vmatprep.mubr.bf16.mxu0 %v3912_v0 }
  0x8c   : > { %1527 = vmatmul.mubr.bf16.gmra.mxu1 %v3921_v36  ;;  %1398 = vmatmul.mubr.bf16.gmra.mxu0 %v3860_v6 }
  0x8d   : > { %1534 = vmatprep.mubr.bf16.mxu1 %v3789_v9  ;;  %1631 = vmatprep.mubr.bf16.mxu0 %v3744_v42  ;;  %v3304_v42 = vld [vmem:[%s4633_s1 + $0x228] sm:$0xff]  }
  0x94   : > { %1535 = vmatmul.mubr.bf16.gmra.mxu1 %v3930_v20  ;;  %1632 = vmatmul.mubr.bf16.vlgmr.msra.gmra.mxu0 %v3563_v56  ;;  %v3307_v56 = vld [vmem:[%s4633_s1 + $0x220] sm:$0xff]  }
  0x95   : > { %1542 = vmatprep.mubr.bf16.mxu1 %v3825_v41  ;;  %3103 = vmatpush3.bf16.msra.mxu0 %v3856_v2  ;;  %v609_v2 = vrot.slane %v3837_v53, 1  ;;  %v3969_v53 = vld [vmem:[%s3489_s30 + $0x90] sm:$0xff]  }
  0x96   : > { %1639 = vmatprep.mubr.bf16.mxu0 %v3782_v37  ;;  %3104 = vmatprep.subr.bf16.mxu0 %v3301_v45  ;;  %v614_v18 = vrot.slane %v3969_v53, 1 }
  0x97   : > { %v3961_v30 = vsel %vm577_vm1, %v608_v11, %v609_v2 }
  0x98   : > { %v3991_v57 = vsel %vm577_vm1, %v614_v18, %v615_v12 }
  0x99   : > { %3105 = vmatpush3.bf16.msra.mxu0 %v3301_v45  ;;  %v624_v45 = vrot.slane %v3638_v29, 1 }
  0x9a   : > { %3106 = vmatprep.subr.bf16.mxu0 %v3304_v42 }
  0x9c   : > { %1543 = vmatmul.mubr.bf16.gmra.mxu1 %v3946_v61  ;;  %1640 = vmatmul.mubr.bf16.gmra.mxu0 %v3609_v17 }
  0x9d   : > { %1550 = vmatprep.mubr.bf16.mxu1 %v3860_v6  ;;  %1647 = vmatprep.mubr.bf16.mxu0 %v3814_v31 }
  0x9e   : > { %3107 = vmatpush3.bf16.msra.mxu0 %v3304_v42 }
  0x9f   : > { %3108 = vmatprep.subr.bf16.mxu0 %v3307_v56 }
  0xa2   : > { %3109 = vmatpush3.bf16.msra.mxu0 %v3307_v56  ;;  %v654_v56 = vshll.u32 %v4012_v43, 16 }
  0xa3   : > { %3110 = vmatprep.subr.bf16.mxu0 %v3309_v28 }
  0xa4   : > { %1551 = vmatmul.mubr.bf16.gmra.mxu1 %v3961_v30  ;;  %1648 = vmatmul.mubr.bf16.gmra.mxu0 %v3656_v48 }
  0xa5   : > { %1558 = vmatprep.mubr.bf16.mxu1 %v3969_v53  ;;  %1655 = vmatprep.mubr.bf16.mxu0 %v3850_v63 }
  0xa6   : > { %3111 = vmatpush3.bf16.msra.mxu0 %v3309_v28  ;;  %v664_v28 = vrot.slane %v4012_v43, 1 }
  0xa7   : > { %3112 = vmatprep.subr.bf16.mxu0 %v3310_v24 }
  0xaa   : > { %3113 = vmatpush3.bf16.msra.mxu0 %v3310_v24 }
  0xab   : > { %3114 = vmatprep.subr.bf16.mxu0 %v3311_v40 }
  0xac   : > { %1559 = vmatmul.mubr.bf16.gmra.mxu1 %v3979_v49  ;;  %1656 = vmatmul.mubr.bf16.gmra.mxu0 %v3716_v16 }
  0xad   : > { %1566 = vmatprep.mubr.bf16.mxu1 %v3537_v38  ;;  %1663 = vmatprep.mubr.bf16.mxu0 %v3889_v39  ;;  %v4009_v38 = vsel %vm577_vm1, %v620_v22, %v621_v14 }
  0xae   : > { %3115 = vmatpush3.bf16.msra.mxu0 %v3311_v40 }
  0xaf   : > { %3116 = vmatprep.subr.bf16.mxu0 %v3312_v52 }
  0xb2   : > { %3117 = vmatpush3.bf16.msra.mxu0 %v3312_v52  ;;  %v652_v52 = vshrl.u32 %v4012_v43, 16 }
  0xb4   : > { %1567 = vmatmul.mubr.bf16.gmra.mxu1 %v3991_v57  ;;  %1664 = vmatmul.mubr.bf16.gmra.mxu0 %v3737_v34 }
  0xb5   : > { %1574 = vmatprep.mubr.bf16.mxu1 %v3586_v1  ;;  %1671 = vmatprep.mubr.bf16.mxu0 %v3909_v55  ;;  %v4021_v1 = vsel %vm577_vm1, %v623_v19, %v624_v45 }
  0xbc   : > { %1575 = vmatmul.mubr.bf16.gmra.mxu1 %v4000_v4  ;;  %1672 = vmatmul.mubr.bf16.gmra.mxu0 %v3756_v47 }
  0xbd   : > { %1582 = vmatprep.mubr.bf16.mxu1 %v3632_v25  ;;  %1679 = vmatprep.mubr.bf16.mxu0 %v3921_v36 }
  0xc4   : > { %1583 = vmatmul.mubr.bf16.gmra.mxu1 %v4009_v38  ;;  %1680 = vmatmul.mubr.bf16.gmra.mxu0 %v3792_v10 }
  0xc5   : > { %1590 = vmatprep.mubr.bf16.mxu1 %v4012_v43  ;;  %1687 = vmatprep.mubr.bf16.mxu0 %v3930_v20 }
  0xcc   : > { %1591 = vmatmul.mubr.bf16.gmra.mxu1 %v4021_v1  ;;  %1688 = vmatmul.mubr.bf16.gmra.mxu0 %v3821_v33 }
  0xcd   : > { %1792 = vmatprep.mubr.bf16.mxu1 %v3609_v17  ;;  %1695 = vmatprep.mubr.bf16.mxu0 %v3946_v61 }
  0xd4   : > { %1793 = vmatmul.mubr.bf16.vlgmr.msra.gmra.mxu1 %v3573_v59  ;;  %1696 = vmatmul.mubr.bf16.gmra.mxu0 %v3863_v8 }
  0xd5   : > { %1800 = vmatprep.mubr.bf16.mxu1 %v3656_v48  ;;  %1703 = vmatprep.mubr.bf16.mxu0 %v3961_v30 }
  0xdc   : > { %1801 = vmatmul.mubr.bf16.gmra.mxu1 %v3625_v23  ;;  %1704 = vmatmul.mubr.bf16.gmra.mxu0 %v3897_v51 }
  0xdd   : > { %1808 = vmatprep.mubr.bf16.mxu1 %v3716_v16  ;;  %1711 = vmatprep.mubr.bf16.mxu0 %v3979_v49 }
  0xe4   : > { %1809 = vmatmul.mubr.bf16.gmra.mxu1 %v3675_v54  ;;  %1712 = vmatmul.mubr.bf16.gmra.mxu0 %v3912_v0 }
  0xe5   : > { %1816 = vmatprep.mubr.bf16.mxu1 %v3737_v34  ;;  %1719 = vmatprep.mubr.bf16.mxu0 %v3991_v57 }
  0xec   : > { %1817 = vmatmul.mubr.bf16.gmra.mxu1 %v3697_v5  ;;  %1720 = vmatmul.mubr.bf16.gmra.mxu0 %v3528_v35 }
  0xed   : > { %1824 = vmatprep.mubr.bf16.mxu1 %v3756_v47  ;;  %1727 = vmatprep.mubr.bf16.mxu0 %v4000_v4 }
  0xf4   : > { %v2646_v59 = vpop.f32.mrf.mxu0  ;;  %v2718_v3 = vpop.f32.mrf.mxu1  ;;  %1825 = vmatmul.mubr.bf16.gmra.mxu1 %v3713_v15  ;;  %1728 = vmatmul.mubr.bf16.gmra.mxu0 %v3570_v58  ;;  %v3313_v15 = vld [vmem:[%s3489_s30 + $0xc8] ss:$0 sps:$4 sm:$0x11]  }
  0xf5   : > { %1832 = vmatprep.mubr.bf16.mxu1 %v3792_v10  ;;  %1735 = vmatprep.mubr.bf16.mxu0 %v4009_v38  ;;  %v665_v24 = vrot.slane %v3313_v15, 1  ;;  %v659_v18 = vshll.u32 %v3313_v15, 16 }
  0xf6   : > { %v2647_v17 = vpop.f32.mrf.mxu0  ;;  %v2719_v23 = vpop.f32.mrf.mxu1 }
  0xf7   : > { %v4047_v25 = vadd.f32 %v2647_v17, %v2646_v59  ;;  %v4049_v29 = vadd.f32 %v2719_v23, %v2718_v3  ;;  %v4072_v62 = vsel %vm577_vm1, %v664_v28, %v665_v24  ;;  %v661_v59 = vrot.slane %v659_v18, 1 }
  0xf8   : > { %v2649_v48 = vpop.f32.mrf.mxu0  ;;  %v2721_v54 = vpop.f32.mrf.mxu1 }
  0xfa   : > { %v2650_v5 = vpop.f32.mrf.mxu0  ;;  %v2722_v16 = vpop.f32.mrf.mxu1 }
  0xfb   : > { %v4051_v34 = vadd.f32 %v2650_v5, %v2649_v48  ;;  %v4053_v47 = vadd.f32 %v2722_v16, %v2721_v54 }
  0xfc   : > { %v2652_v26 = vpop.f32.mrf.mxu0  ;;  %v2724_v27 = vpop.f32.mrf.mxu1  ;;  %1833 = vmatmul.mubr.bf16.gmra.mxu1 %v3747_v44  ;;  %1736 = vmatmul.mubr.bf16.gmra.mxu0 %v3619_v21 }
  0xfd   : > { %1840 = vmatprep.mubr.bf16.mxu1 %v3821_v33  ;;  %1743 = vmatprep.mubr.bf16.mxu0 %v4021_v1  ;;  %v656_v33 = vrot.slane %v654_v56, 1 }
  0xfe   : > { %v2653_v10 = vpop.f32.mrf.mxu0  ;;  %v2725_v42 = vpop.f32.mrf.mxu1 }
  0xff   : > { %v4061_v11 = vadd.f32 %v2653_v10, %v2652_v26  ;;  %v4063_v2 = vadd.f32 %v2725_v42, %v2724_v27  ;;  %v657_v45 = vor.u32 %v656_v33, %v652_v52 }
 0x100   : > { %v2655_v32 = vpop.f32.mrf.mxu0  ;;  %v2727_v7 = vpop.f32.mrf.mxu1 }
 0x102   : > { %v2656_v44 = vpop.f32.mrf.mxu0  ;;  %v2728_v40 = vpop.f32.mrf.mxu1 }
 0x103   : > { %v4067_v13 = vadd.f32 %v2656_v44, %v2655_v32  ;;  %v4069_v12 = vadd.f32 %v2728_v40, %v2727_v7 }
 0x104   : > { %v2658_v60 = vpop.f32.mrf.mxu0  ;;  %v2730_v22 = vpop.f32.mrf.mxu1  ;;  %1841 = vmatmul.mubr.bf16.gmra.mxu1 %v3753_v46  ;;  %1744 = vmatmul.mubr.bf16.gmra.mxu0 %v3663_v50  ;;  %v4083_v46 = vsel %vm368_vm0, %v657_v45, %v661_v59 }
 0x105   : > { %1848 = vmatprep.mubr.bf16.mxu1 %v3863_v8  ;;  %1751 = vmatprep.mubr.bf16.mxu0 %v4072_v62 }
 0x106   : > { %v2659_v14 = vpop.f32.mrf.mxu0  ;;  %v2731_v19 = vpop.f32.mrf.mxu1 }
 0x107   : > { %v4078_v3 = vadd.f32 %v2659_v14, %v2658_v60  ;;  %v4080_v17 = vadd.f32 %v2731_v19, %v2730_v22 }
 0x108   : > { %v2661_v23 = vpop.f32.mrf.mxu0  ;;  %v2733_v48 = vpop.f32.mrf.mxu1 }
 0x10a   : > { %v2662_v54 = vpop.f32.mrf.mxu0  ;;  %v2734_v5 = vpop.f32.mrf.mxu1 }
 0x10b   : > { %v4085_v16 = vadd.f32 %v2662_v54, %v2661_v23  ;;  %v4087_v8 = vadd.f32 %v2734_v5, %v2733_v48 }
 0x10c   : > { %v2664_v15 = vpop.f32.mrf.mxu0  ;;  %v2736_v26 = vpop.f32.mrf.mxu1  ;;  %1849 = vmatmul.mubr.bf16.gmra.mxu1 %v3789_v9  ;;  %1752 = vmatmul.mubr.bf16.gmra.mxu0 %v4083_v46 }
 0x10d   : > { %1856 = vmatprep.mubr.bf16.mxu1 %v3897_v51  ;;  %3118 = vmatprep.mubr.bf16.mxu0 %v3782_v37  ;;  %v4107_v37 = vld [vmem:[%s4634_s2] ss:$0 sm:$0xff] }
 0x10e   : > { %v2665_v27 = vpop.f32.mrf.mxu0  ;;  %v2737_v10 = vpop.f32.mrf.mxu1  ;;  %v1312_v33 = vadd.f32 %v4047_v25, %v4107_v37  ;;  %v1315_v19 = vadd.f32 %v4051_v34, %v4107_v37  ;;  %v1320_v34 = vadd.f32 %v4061_v11, %v4107_v37 }
 0x10f   : > { %v4093_v42 = vadd.f32 %v2665_v27, %v2664_v15  ;;  %v4095_v56 = vadd.f32 %v2737_v10, %v2736_v26 }
 0x110   : > { %v2667_v28 = vpop.f32.mrf.mxu0  ;;  %v2739_v24 = vpop.f32.mrf.mxu1 }
 0x112   : > { %v2668_v32 = vpop.f32.mrf.mxu0  ;;  %v2740_v7 = vpop.f32.mrf.mxu1 }
 0x113   : > { %v4097_v44 = vadd.f32 %v2668_v32, %v2667_v28  ;;  %v4099_v40 = vadd.f32 %v2740_v7, %v2739_v24 }
 0x114   : > { %v2758_v9 = vpop.f32.mrf.mxu1  ;;  %1857 = vmatmul.mubr.bf16.gmra.mxu1 %v3825_v41  ;;  %v2670_v51 = vpop.f32.mrf.mxu0  ;;  %3119 = vmatmul.mubr.bf16.vlgmr.msra.gmra.mxu0 %v3814_v31 }
 0x115   : > { %1864 = vmatprep.mubr.bf16.mxu1 %v3912_v0  ;;  %3122 = vmatprep.mubr.bf16.mxu0 %v3850_v63 }
 0x116   : > { %v2759_v52 = vpop.f32.mrf.mxu1  ;;  %v2671_v18 = vpop.f32.mrf.mxu0 }
 0x117   : > { %v2760_v60 = vadd.f32 %v2759_v52, %v2758_v9  ;;  %v4112_v22 = vadd.f32 %v2671_v18, %v2670_v51 }
 0x118   : > { %v2761_v41 = vpop.f32.mrf.mxu1  ;;  %v2673_v31 = vpop.f32.mrf.mxu0 }
 0x119   : > { %v4114_v14 = vadd.f32 %v2760_v60, %v1312_v33 }
 0x11a   : > { %v2762_v0 = vpop.f32.mrf.mxu1  ;;  %v2674_v45 = vpop.f32.mrf.mxu0 }
 0x11b   : > { %v2763_v59 = vadd.f32 %v2762_v0, %v2761_v41  ;;  %v4118_v23 = vadd.f32 %v2674_v45, %v2673_v31 }
 0x11c   : > { %v2764_v63 = vpop.f32.mrf.mxu1  ;;  %1865 = vmatmul.mubr.bf16.gmra.mxu1 %v3860_v6  ;;  %v2676_v48 = vpop.f32.mrf.mxu0  ;;  %3123 = vmatmul.mubr.bf16.gmra.mxu0 %v3889_v39  ;;  %v1323_v39 = vadd.f32 %v4067_v13, %v4107_v37  ;;  %v1328_v13 = vadd.f32 %v4078_v3, %v4107_v37 }
 0x11d   : > { %v4121_v25 = vadd.f32 %v2763_v59, %v1315_v19  ;;  %1872 = vmatprep.mubr.bf16.mxu1 %v3528_v35  ;;  %3126 = vmatprep.mubr.bf16.mxu0 %v3909_v55  ;;  %v3318_v19 = vld [vmem:[%s3489_s30 + $0x9c] sm:$0xff]  }
 0x11e   : > { %v2765_v54 = vpop.f32.mrf.mxu1  ;;  %v2677_v5 = vpop.f32.mrf.mxu0 }
 0x11f   : > { %v2766_v15 = vadd.f32 %v2765_v54, %v2764_v63  ;;  %v4128_v26 = vadd.f32 %v2677_v5, %v2676_v48 }
 0x120   : > { %v2767_v27 = vpop.f32.mrf.mxu1  ;;  %v2679_v6 = vpop.f32.mrf.mxu0 }
 0x121   : > { %v4130_v10 = vadd.f32 %v2766_v15, %v1320_v34 }
 0x122   : > { %v2768_v28 = vpop.f32.mrf.mxu1  ;;  %v2680_v24 = vpop.f32.mrf.mxu0 }
 0x123   : > { %v2769_v35 = vadd.f32 %v2768_v28, %v2767_v27  ;;  %v4134_v32 = vadd.f32 %v2680_v24, %v2679_v6 }
 0x124   : > { %v2770_v55 = vpop.f32.mrf.mxu1  ;;  %1873 = vmatmul.mubr.bf16.gmra.mxu1 %v3969_v53  ;;  %v2682_v7 = vpop.f32.mrf.mxu0  ;;  %3127 = vmatmul.mubr.bf16.gmra.mxu0 %v3921_v36  ;;  %v1331_v36 = vadd.f32 %v4085_v16, %v4107_v37  ;;  %v1336_v16 = vadd.f32 %v4093_v42, %v4107_v37 }
 0x125   : > { %v4137_v11 = vadd.f32 %v2769_v35, %v1323_v39  ;;  %1880 = vmatprep.mubr.bf16.mxu1 %v3570_v58  ;;  %3130 = vmatprep.mubr.bf16.mxu0 %v3930_v20  ;;  %v3319_v39 = vld [vmem:[%s3489_s30 + $0xa8] sm:$0xff]  }
 0x126   : > { %v2771_v9 = vpop.f32.mrf.mxu1  ;;  %v2683_v51 = vpop.f32.mrf.mxu0 }
 0x127   : > { %v2772_v52 = vadd.f32 %v2771_v9, %v2770_v55  ;;  %v4144_v33 = vadd.f32 %v2683_v51, %v2682_v7  ;;  %v3315_v7 = vld [vmem:[%s3489_s30 + $0xd4] ss:$0 sps:$4 sm:$0x11]   ;;  %v1344_v9 = vadd.f32 %v4112_v22, %v4107_v37 }
 0x128   : > { %v2773_v18 = vpop.f32.mrf.mxu1  ;;  %v2685_v60 = vpop.f32.mrf.mxu0 }
 0x129   : > { %v4146_v53 = vadd.f32 %v2772_v52, %v1328_v13 }
 0x12a   : > { %v2774_v41 = vpop.f32.mrf.mxu1  ;;  %v2686_v58 = vpop.f32.mrf.mxu0 }
 0x12b   : > { %v2775_v31 = vadd.f32 %v2774_v41, %v2773_v18  ;;  %v4150_v0 = vadd.f32 %v2686_v58, %v2685_v60  ;;  %v1347_v58 = vadd.f32 %v4118_v23, %v4107_v37  ;;  %v1352_v23 = vadd.f32 %v4128_v26, %v4107_v37 }
 0x12c   : > { %v2776_v20 = vpop.f32.mrf.mxu1  ;;  %1881 = vmatmul.mubr.bf16.gmra.mxu1 %v3318_v19  ;;  %v2688_v45 = vpop.f32.mrf.mxu0  ;;  %3131 = vmatmul.mubr.bf16.gmra.mxu0 %v3946_v61  ;;  %v4165_v61 = vld [vmem:[%s3489_s30 + $0xcc] sm:$0xff]  }
 0x12d   : > { %v4153_v3 = vadd.f32 %v2775_v31, %v1331_v36  ;;  %1888 = vmatprep.mubr.bf16.mxu1 %v3619_v21  ;;  %3134 = vmatprep.mubr.bf16.mxu0 %v3961_v30  ;;  %v1339_v21 = vadd.f32 %v4097_v44, %v4107_v37  ;;  %v680_v44 = vshll.u32 %v4165_v61, 16 }
 0x12e   : > { %v2777_v59 = vpop.f32.mrf.mxu1  ;;  %v2689_v63 = vpop.f32.mrf.mxu0 }
 0x12f   : > { %v2778_v48 = vadd.f32 %v2777_v59, %v2776_v20  ;;  %v4160_v54 = vadd.f32 %v2689_v63, %v2688_v45  ;;  %v682_v36 = vrot.slane %v680_v44, 1  ;;  %v3320_v45 = vld [vmem:[%s3489_s30 + $0xb4] sm:$0xff]   ;;  %s161_s30 = sand.u32 1, %s3373_s13  }
 0x130   : > { %v2779_v34 = vpop.f32.mrf.mxu1  ;;  %v2691_v15 = vpop.f32.mrf.mxu0  ;;  %s2354_s11 = sshll.u32 %s161_s30, 7  ;;  %s4592_s27 = scalar_lea.sflag [#allocation3], %s161_s30 }
 0x131   : > { %v4162_v5 = vadd.f32 %v2778_v48, %v1336_v16  ;;  %s4497_s17 = scalar_lea.vmem [#allocation2], %s2354_s11 }
 0x132   : > { %v2780_v27 = vpop.f32.mrf.mxu1  ;;  %v2692_v6 = vpop.f32.mrf.mxu0  ;;  %s2288_s20 = sshll.u32 %s4497_s17, 4  ;;  %s4587_s20 = int_to_ptr.vmem [resolvable:$true] %s2288_s20 }
 0x133   : > { %v2781_v30 = vadd.f32 %v2780_v27, %v2779_v34  ;;  %v4169_v28 = vadd.f32 %v2692_v6, %v2691_v15  ;;  %s3321_s16 = scalar_lea.vmem %s4587_s20, 2048  ;;  %p3328_p0 = scmp.lt.s32.totalorder %s4587_s20, %s3326_s29 }
 0x134   : > { %v2782_v42 = vpop.f32.mrf.mxu1  ;;  %1889 = vmatmul.mubr.bf16.gmra.mxu1 %v3319_v39  ;;  %v2694_v35 = vpop.f32.mrf.mxu0  ;;  %3135 = vmatmul.mubr.bf16.gmra.mxu0 %v3979_v49  ;;  %p3322_p11 = scmp.ne.s32.totalorder %s4587_s20, %s3321_s16  ;;  %p3329_p1 = scmp.lt.s32.totalorder %s3327_s4, %s3321_s16 }
 0x135   : > { %v4172_v24 = vadd.f32 %v2781_v30, %v1339_v21  ;;  %1896 = vmatprep.mubr.bf16.mxu1 %v3663_v50  ;;  %3138 = vmatprep.mubr.bf16.mxu0 %v3991_v57  ;;  %v678_v50 = vshrl.u32 %v4165_v61, 16  ;;  %v685_v57 = vshll.u32 %v3315_v7, 16 }
 0x136   : > { %v2783_v55 = vpop.f32.mrf.mxu1  ;;  %v2695_v13 = vpop.f32.mrf.mxu0  ;;  %p3323_p12 = pnand %p3322_p11, %p3444_p5  ;;  %p3330_p2 = por %p3329_p1, %p3328_p0 }
 0x137   : > { %v2784_v51 = vadd.f32 %v2783_v55, %v2782_v42  ;;  %v4181_v52 = vadd.f32 %v2695_v13, %v2694_v35  ;;  %v683_v48 = vor.u32 %v682_v36, %v678_v50  ;;  %v687_v34 = vrot.slane %v685_v57, 1 }
 0x138   : > { %v2785_v18 = vpop.f32.mrf.mxu1  ;;  %v2697_v49 = vpop.f32.mrf.mxu0  ;;  %p3324_p13 = pneg %p3323_p12 }
 0x139   : > { %v4183_v60 = vadd.f32 %v2784_v51, %v1344_v9  ;;  %v690_v51 = vrot.slane %v4165_v61, 1 }
 0x13a   : > { %v2786_v41 = vpop.f32.mrf.mxu1  ;;  %v2698_v31 = vpop.f32.mrf.mxu0  ;;  %p3331_p3 = pnand %p3330_p2, %p3324_p13 }
 0x13b   : > { %v2787_v20 = vadd.f32 %v2786_v41, %v2785_v18  ;;  %v4188_v22 = vadd.f32 %v2698_v31, %v2697_v49  ;;  %v691_v18 = vrot.slane %v3315_v7, 1 }
 0x13c   : > { %v2788_v19 = vpop.f32.mrf.mxu1  ;;  %1897 = vmatmul.mubr.bf16.gmra.mxu1 %v3320_v45  ;;  %v2700_v16 = vpop.f32.mrf.mxu0  ;;  %3139 = vmatmul.mubr.bf16.gmra.mxu0 %v4000_v4  ;;  %v688_v4 = vsel %vm368_vm0, %v683_v48, %v687_v34 }
 0x13d   : > { %v4191_v59 = vadd.f32 %v2787_v20, %v1347_v58  ;;  %1904 = vmatprep.mubr.bf16.mxu1 %v4083_v46  ;;  %3142 = vmatprep.mubr.bf16.mxu0 %v4009_v38  ;;  %v1355_v46 = vadd.f32 %v4134_v32, %v4107_v37  ;;  %v1360_v32 = vadd.f32 %v4144_v33, %v4107_v37 }
 0x13e   : > { %v2789_v63 = vpop.f32.mrf.mxu1  ;;  %v2701_v15 = vpop.f32.mrf.mxu0 }
 0x13f   : > { %v2790_v27 = vadd.f32 %v2789_v63, %v2788_v19  ;;  %v4198_v21 = vadd.f32 %v2701_v15, %v2700_v16  ;;  %v1368_v63 = vadd.f32 %v4160_v54, %v4107_v37 }
 0x140   : > { %v2791_v6 = vpop.f32.mrf.mxu1  ;;  %v2703_v42 = vpop.f32.mrf.mxu0 }
 0x141   : > { %v4200_v30 = vadd.f32 %v2790_v27, %v1352_v23 }
 0x142   : > { %v2792_v39 = vpop.f32.mrf.mxu1  ;;  %v2704_v38 = vpop.f32.mrf.mxu0 }
 0x143   : > { %v2793_v35 = vadd.f32 %v2792_v39, %v2791_v6  ;;  %v4205_v55 = vadd.f32 %v2704_v38, %v2703_v42 }
 0x144   : > { %v2794_v44 = vpop.f32.mrf.mxu1  ;;  %1905 = vmatmul.mubr.bf16.gmra.mxu1 %v4012_v43  ;;  %v2706_v9 = vpop.f32.mrf.mxu0  ;;  %3143 = vmatmul.mubr.bf16.gmra.mxu0 %v4021_v1  ;;  %v692_v1 = vsel %vm577_vm1, %v690_v51, %v691_v18 }
 0x145   : > { %v4208_v26 = vadd.f32 %v2793_v35, %v1355_v46  ;;  %1912 = vmatprep.mubr.bf16.mxu1 %v688_v4  ;;  %3146 = vmatprep.mubr.bf16.mxu0 %v4072_v62  ;;  %v1363_v62 = vadd.f32 %v4150_v0, %v4107_v37 }
 0x146   : > { %v2795_v13 = vpop.f32.mrf.mxu1  ;;  %v2707_v49 = vpop.f32.mrf.mxu0 }
 0x147   : > { %v2796_v41 = vadd.f32 %v2795_v13, %v2794_v44  ;;  %v4215_v50 = vadd.f32 %v2707_v49, %v2706_v9  ;;  %v1376_v44 = vadd.f32 %v4181_v52, %v4107_v37 }
 0x148   : > { %v2797_v43 = vpop.f32.mrf.mxu1  ;;  %v2709_v57 = vpop.f32.mrf.mxu0 }
 0x149   : > { %v4217_v36 = vadd.f32 %v2796_v41, %v1360_v32 }
 0x14a   : > { %v2798_v58 = vpop.f32.mrf.mxu1  ;;  %v2710_v31 = vpop.f32.mrf.mxu0 }
 0x14b   : > { %v2799_v20 = vadd.f32 %v2798_v58, %v2797_v43  ;;  %v4222_v7 = vadd.f32 %v2710_v31, %v2709_v57  ;;  %v1379_v43 = vadd.f32 %v4188_v22, %v4107_v37 }
 0x14c   : > { %v2800_v19 = vpop.f32.mrf.mxu1  ;;  %1913 = vmatmul.mubr.bf16.gmra.mxu1 %v4165_v61  ;;  %v2712_v45 = vpop.f32.mrf.mxu0  ;;  %3147 = vmatmul.mubr.bf16.gmra.mxu0 %v692_v1  ;;  %v1371_v61 = vadd.f32 %v4169_v28, %v4107_v37 }
 0x14d   : > { %v4225_v33 = vadd.f32 %v2799_v20, %v1363_v62 }
 0x14e   : > { %v2801_v16 = vpop.f32.mrf.mxu1  ;;  %v2713_v48 = vpop.f32.mrf.mxu0 }
 0x14f   : > { %v2802_v34 = vadd.f32 %v2801_v16, %v2800_v19  ;;  %v4229_v23 = vadd.f32 %v2713_v48, %v2712_v45  ;;  %v1384_v45 = vadd.f32 %v4198_v21, %v4107_v37 }
 0x150   : > { %v2803_v0 = vpop.f32.mrf.mxu1  ;;  %v2715_v27 = vpop.f32.mrf.mxu0 }
 0x151   : > { %v4231_v15 = vadd.f32 %v2802_v34, %v1368_v63 }
 0x152   : > { %v2804_v6 = vpop.f32.mrf.mxu1  ;;  %v2716_v42 = vpop.f32.mrf.mxu0 }
 0x153   : > { %v2805_v39 = vadd.f32 %v2804_v6, %v2803_v0  ;;  %v4235_v4 = vadd.f32 %v2716_v42, %v2715_v27  ;;  %v1387_v6 = vadd.f32 %v4205_v55, %v4107_v37 }
 0x154   : > { %v2806_v46 = vpop.f32.mrf.mxu1  ;;  %v2870_v54 = vpop.f32.mrf.mxu0 }
 0x155   : > { %v4237_v38 = vadd.f32 %v2805_v39, %v1371_v61 }
 0x156   : > { %v2807_v35 = vpop.f32.mrf.mxu1  ;;  %v2871_v13 = vpop.f32.mrf.mxu0 }
 0x157   : > { %v2808_v9 = vadd.f32 %v2807_v35, %v2806_v46  ;;  %v2872_v51 = vadd.f32 %v2871_v13, %v2870_v54 }
 0x158   : > { %v2809_v18 = vpop.f32.mrf.mxu1  ;;  %v2873_v49 = vpop.f32.mrf.mxu0 }
 0x159   : > { %v4241_v32 = vadd.f32 %v2808_v9, %v1376_v44  ;;  %v4244_v28 = vadd.f32 %v2872_v51, %v4114_v14  ;;  %v1392_v44 = vadd.f32 %v4215_v50, %v4107_v37 }
 0x15a   : > { %v2810_v41 = vpop.f32.mrf.mxu1  ;;  %v2874_v58 = vpop.f32.mrf.mxu0 }
 0x15b   : > { %v2811_v57 = vadd.f32 %v2810_v41, %v2809_v18  ;;  %v2875_v1 = vadd.f32 %v2874_v58, %v2873_v49 }
 0x15c   : > { %v2812_v62 = vpop.f32.mrf.mxu1  ;;  %v2876_v52 = vpop.f32.mrf.mxu0 }
 0x15d   : > { %v4248_v31 = vadd.f32 %v2811_v57, %v1379_v43  ;;  %v4251_v20 = vadd.f32 %v2875_v1, %v4121_v25  ;;  %v1395_v43 = vadd.f32 %v4222_v7, %v4107_v37 }
 0x15e   : > { %v2813_v19 = vpop.f32.mrf.mxu1  ;;  %v2877_v16 = vpop.f32.mrf.mxu0 }
 0x15f   : > { %v2814_v14 = vadd.f32 %v2813_v19, %v2812_v62  ;;  %v2878_v63 = vadd.f32 %v2877_v16, %v2876_v52 }
 0x160   : > { %v2815_v48 = vpop.f32.mrf.mxu1  ;;  %v2879_v22 = vpop.f32.mrf.mxu0 }
 0x161   : > { %v4255_v34 = vadd.f32 %v2814_v14, %v1384_v45  ;;  %v4258_v0 = vadd.f32 %v2878_v63, %v4130_v10  ;;  %v1400_v45 = vadd.f32 %v4229_v23, %v4107_v37 }
 0x162   : > { %v2816_v27 = vpop.f32.mrf.mxu1  ;;  %v2880_v61 = vpop.f32.mrf.mxu0 }
 0x163   : > { %v2817_v25 = vadd.f32 %v2816_v27, %v2815_v48  ;;  %v2881_v42 = vadd.f32 %v2880_v61, %v2879_v22 }
 0x164   : > { %v2818_v39 = vpop.f32.mrf.mxu1  ;;  %v2882_v21 = vpop.f32.mrf.mxu0 }
 0x165   : > { %v4262_v46 = vadd.f32 %v2817_v25, %v1387_v6  ;;  %v4265_v54 = vadd.f32 %v2881_v42, %v4137_v11  ;;  %v1403_v6 = vadd.f32 %v4235_v4, %v4107_v37 }
 0x166   : > { %v2819_v35 = vpop.f32.mrf.mxu1  ;;  %v2883_v9 = vpop.f32.mrf.mxu0 }
 0x167   : > { %v2820_v10 = vadd.f32 %v2819_v35, %v2818_v39  ;;  %v2884_v13 = vadd.f32 %v2883_v9, %v2882_v21 }
 0x168   : > { %v2821_v51 = vpop.f32.mrf.mxu1  ;;  %v2885_v55 = vpop.f32.mrf.mxu0 }
 0x169   : > { %v4269_v18 = vadd.f32 %v2820_v10, %v1392_v44  ;;  %v4272_v49 = vadd.f32 %v2884_v13, %v4146_v53  ;;  %v1408_v44 = vadd.f32 %v4049_v29, %v4107_v37 }
 0x16a   : > { %v2822_v41 = vpop.f32.mrf.mxu1  ;;  %v2886_v57 = vpop.f32.mrf.mxu0 }
 0x16b   : > { %v2823_v11 = vadd.f32 %v2822_v41, %v2821_v51  ;;  %v2887_v58 = vadd.f32 %v2886_v57, %v2885_v55 }
 0x16c   : > { %v2824_v1 = vpop.f32.mrf.mxu1  ;;  %v2888_v50 = vpop.f32.mrf.mxu0 }
 0x16d   : > { %v4276_v62 = vadd.f32 %v2823_v11, %v1395_v43  ;;  %v4279_v52 = vadd.f32 %v2887_v58, %v4153_v3  ;;  %v1411_v43 = vadd.f32 %v4053_v47, %v4107_v37 }
 0x16e   : > { %v2825_v19 = vpop.f32.mrf.mxu1  ;;  %v2889_v14 = vpop.f32.mrf.mxu0 }
 0x16f   : > { %v2826_v53 = vadd.f32 %v2825_v19, %v2824_v1  ;;  %v2890_v16 = vadd.f32 %v2889_v14, %v2888_v50 }
 0x170   : > { %v2827_v63 = vpop.f32.mrf.mxu1  ;;  %v2891_v7 = vpop.f32.mrf.mxu0 }
 0x171   : > { %v4283_v48 = vadd.f32 %v2826_v53, %v1400_v45  ;;  %v4286_v22 = vadd.f32 %v2890_v16, %v4162_v5  ;;  %v1416_v45 = vadd.f32 %v4063_v2, %v4107_v37 }
 0x172   : > { %v2828_v27 = vpop.f32.mrf.mxu1  ;;  %v2892_v25 = vpop.f32.mrf.mxu0 }
 0x173   : > { %v2829_v3 = vadd.f32 %v2828_v27, %v2827_v63  ;;  %v2893_v61 = vadd.f32 %v2892_v25, %v2891_v7 }
 0x174   : > { %v2830_v42 = vpop.f32.mrf.mxu1  ;;  %v2894_v23 = vpop.f32.mrf.mxu0 }
 0x175   : > { %v4290_v39 = vadd.f32 %v2829_v3, %v1403_v6  ;;  %v4293_v21 = vadd.f32 %v2893_v61, %v4172_v24  ;;  %v1419_v6 = vadd.f32 %v4069_v12, %v4107_v37 }
 0x176   : > { %v2831_v35 = vpop.f32.mrf.mxu1  ;;  %v2895_v10 = vpop.f32.mrf.mxu0 }
 0x177   : > { %v2832_v5 = vadd.f32 %v2831_v35, %v2830_v42  ;;  %v2896_v9 = vadd.f32 %v2895_v10, %v2894_v23 }
 0x178   : > { %v2833_v13 = vpop.f32.mrf.mxu1  ;;  %v2897_v4 = vpop.f32.mrf.mxu0 }
 0x179   : > { %v4297_v51 = vadd.f32 %v2832_v5, %v1408_v44  ;;  %v4300_v55 = vadd.f32 %v2896_v9, %v4183_v60  ;;  %v1424_v44 = vadd.f32 %v4080_v17, %v4107_v37 }
 0x17a   : > { %v2834_v41 = vpop.f32.mrf.mxu1  ;;  %v2898_v11 = vpop.f32.mrf.mxu0 }
 0x17b   : > { %v2835_v24 = vadd.f32 %v2834_v41, %v2833_v13  ;;  %v2899_v57 = vadd.f32 %v2898_v11, %v2897_v4 }
 0x17c   : > { %v2836_v58 = vpop.f32.mrf.mxu1  ;;  %v2900_v29 = vpop.f32.mrf.mxu0 }
 0x17d   : > { %v4304_v1 = vadd.f32 %v2835_v24, %v1411_v43  ;;  %v4307_v50 = vadd.f32 %v2899_v57, %v4191_v59  ;;  %v1427_v43 = vadd.f32 %v4087_v8, %v4107_v37 }
 0x17e   : > { %v2837_v19 = vpop.f32.mrf.mxu1  ;;  %v2901_v53 = vpop.f32.mrf.mxu0 }
 0x17f   : > { %v2838_v60 = vadd.f32 %v2837_v19, %v2836_v58  ;;  %v2902_v14 = vadd.f32 %v2901_v53, %v2900_v29 }
 0x180   : > { %v2839_v16 = vpop.f32.mrf.mxu1  ;;  %v2903_v47 = vpop.f32.mrf.mxu0 }
 0x181   : > { %v4311_v63 = vadd.f32 %v2838_v60, %v1416_v45  ;;  %v4314_v7 = vadd.f32 %v2902_v14, %v4200_v30  ;;  %v1432_v45 = vadd.f32 %v4095_v56, %v4107_v37 }
 0x182   : > { %v2840_v27 = vpop.f32.mrf.mxu1  ;;  %v2904_v3 = vpop.f32.mrf.mxu0 }
 0x183   : > { %v2841_v59 = vadd.f32 %v2840_v27, %v2839_v16  ;;  %v2905_v25 = vadd.f32 %v2904_v3, %v2903_v47 }
 0x184   : > { %v2842_v61 = vpop.f32.mrf.mxu1  ;;  %v2906_v2 = vpop.f32.mrf.mxu0 }
 0x185   : > { %v4318_v42 = vadd.f32 %v2841_v59, %v1419_v6  ;;  %v4321_v23 = vadd.f32 %v2905_v25, %v4208_v26  ;;  %v1435_v6 = vadd.f32 %v4099_v40, %v4107_v37 }
 0x186   : > { %v2843_v35 = vpop.f32.mrf.mxu1  ;;  %v2907_v5 = vpop.f32.mrf.mxu0 }
 0x187   : > { %v2844_v30 = vadd.f32 %v2843_v35, %v2842_v61  ;;  %v2908_v10 = vadd.f32 %v2907_v5, %v2906_v2 }
 0x188   : > { %v2845_v9 = vpop.f32.mrf.mxu1  ;;  %v2909_v12 = vpop.f32.mrf.mxu0 }
 0x189   : > { %v4325_v13 = vadd.f32 %v2844_v30, %v1424_v44  ;;  %v4328_v4 = vadd.f32 %v2908_v10, %v4217_v36 }
 0x18a   : > { %v2846_v41 = vpop.f32.mrf.mxu1  ;;  %v2910_v24 = vpop.f32.mrf.mxu0 }
 0x18b   : > { %v2847_v26 = vadd.f32 %v2846_v41, %v2845_v9  ;;  %v2911_v11 = vadd.f32 %v2910_v24, %v2909_v12 }
 0x18c   : > { %v2848_v57 = vpop.f32.mrf.mxu1  ;;  %v2912_v17 = vpop.f32.mrf.mxu0 }
 0x18d   : > { %v4332_v58 = vadd.f32 %v2847_v26, %v1427_v43  ;;  %v4335_v29 = vadd.f32 %v2911_v11, %v4225_v33 }
 0x18e   : > { %v2849_v19 = vpop.f32.mrf.mxu1  ;;  %v2913_v60 = vpop.f32.mrf.mxu0 }
 0x18f   : > { %v2850_v36 = vadd.f32 %v2849_v19, %v2848_v57  ;;  %v2914_v53 = vadd.f32 %v2913_v60, %v2912_v17 }
 0x190   : > { %v2851_v14 = vpop.f32.mrf.mxu1  ;;  %v2915_v8 = vpop.f32.mrf.mxu0 }
 0x191   : > { %v4339_v16 = vadd.f32 %v2850_v36, %v1432_v45  ;;  %v4342_v47 = vadd.f32 %v2914_v53, %v4231_v15 }
 0x192   : > { %v2852_v27 = vpop.f32.mrf.mxu1  ;;  %v2916_v59 = vpop.f32.mrf.mxu0 }
 0x193   : > { %v2853_v33 = vadd.f32 %v2852_v27, %v2851_v14  ;;  %v2917_v3 = vadd.f32 %v2916_v59, %v2915_v8 }
 0x194   : > { %v2982_v25 = vpop.f32.mrf.mxu1  ;;  %v2918_v56 = vpop.f32.mrf.mxu0 }
 0x195   : > { %v4346_v61 = vadd.f32 %v2853_v33, %v1435_v6  ;;  %v4349_v2 = vadd.f32 %v2917_v3, %v4237_v38 }
 0x196   : > { %v2983_v35 = vpop.f32.mrf.mxu1  ;;  %v2919_v44 = vpop.f32.mrf.mxu0 }
 0x197   : > { %4638 = vst [vmem:[#allocation5_spill] sm:$0xff] %v4346_v61  ;;  %v2984_v30 = vadd.f32 %v2983_v35, %v2982_v25  ;;  %v2920_v5 = vadd.f32 %v2919_v44, %v2918_v56 }
 0x198   : > { %v4351_v15 = vpop.f32.mrf.mxu1  ;;  %v2921_v10 = vpop.f32.mrf.mxu0 }
 0x199   : > { %v4354_v9 = vadd.f32 %v2984_v30, %v4244_v28  ;;  %v4357_v40 = vadd.f32 %v2920_v5, %v4241_v32 }
 0x19a   : > { %v4359_v37 = vpop.f32.mrf.mxu1  ;;  %v2922_v12 = vpop.f32.mrf.mxu0 }
 0x19b   : > { %v2923_v41 = vadd.f32 %v2922_v12, %v2921_v10 }
 0x19c   : > { %v4361_v43 = vpop.f32.mrf.mxu1  ;;  %v2924_v38 = vpop.f32.mrf.mxu0 }
 0x19d   : > { %v4364_v26 = vadd.f32 %v2923_v41, %v4248_v31 }
 0x19e   : > { %v4366_v24 = vpop.f32.mrf.mxu1  ;;  %v2925_v11 = vpop.f32.mrf.mxu0 }
 0x19f   : > { %v2926_v57 = vadd.f32 %v2925_v11, %v2924_v38 }
 0x1a0   : > { %v4368_v17 = vpop.f32.mrf.mxu1  ;;  %v2927_v28 = vpop.f32.mrf.mxu0 }
 0x1a1   : > { %v4371_v32 = vadd.f32 %v2926_v57, %v4255_v34 }
 0x1a2   : > { %v4373_v19 = vpop.f32.mrf.mxu1  ;;  %v2928_v45 = vpop.f32.mrf.mxu0 }
 0x1a3   : > { %v2929_v36 = vadd.f32 %v2928_v45, %v2927_v28 }
 0x1a4   : > { %v4375_v60 = vpop.f32.mrf.mxu1  ;;  %v2930_v53 = vpop.f32.mrf.mxu0 }
 0x1a5   : > { %v4378_v31 = vadd.f32 %v2929_v36, %v4262_v46 }
 0x1a6   : > { %v4380_v14 = vpop.f32.mrf.mxu1  ;;  %v2931_v8 = vpop.f32.mrf.mxu0 }
 0x1a7   : > { %v2932_v27 = vadd.f32 %v2931_v8, %v2930_v53 }
 0x1a8   : > { %v4382_v6 = vpop.f32.mrf.mxu1  ;;  %v2933_v33 = vpop.f32.mrf.mxu0 }
 0x1a9   : > { %v4385_v34 = vadd.f32 %v2932_v27, %v4269_v18 }
 0x1aa   : > { %v4387_v59 = vpop.f32.mrf.mxu1  ;;  %v2934_v3 = vpop.f32.mrf.mxu0 }
 0x1ab   : > { %v2935_v25 = vadd.f32 %v2934_v3, %v2933_v33 }
 0x1ac   : > { %v4389_v56 = vpop.f32.mrf.mxu1  ;;  %v2936_v35 = vpop.f32.mrf.mxu0 }
 0x1ad   : > { %v4392_v46 = vadd.f32 %v2935_v25, %v4276_v62 }
 0x1ae   : > { %v4394_v44 = vpop.f32.mrf.mxu1  ;;  %v2937_v30 = vpop.f32.mrf.mxu0 }
 0x1af   : > { %4639 = vst [vmem:[#allocation6_spill] sm:$0xff] %v4392_v46  ;;  %v2938_v5 = vadd.f32 %v2937_v30, %v2936_v35 }
 0x1b0   : > { %v4396_v10 = vpop.f32.mrf.mxu1  ;;  %v2939_v12 = vpop.f32.mrf.mxu0 }
 0x1b1   : > { %v4399_v18 = vadd.f32 %v2938_v5, %v4283_v48 }
 0x1b2   : > { %v4401_v41 = vpop.f32.mrf.mxu1  ;;  %v2940_v38 = vpop.f32.mrf.mxu0 }
 0x1b3   : > { %v2941_v11 = vadd.f32 %v2940_v38, %v2939_v12 }
 0x1b4   : > { %v4403_v57 = vpop.f32.mrf.mxu1  ;;  %v2942_v28 = vpop.f32.mrf.mxu0 }
 0x1b5   : > { %v4406_v62 = vadd.f32 %v2941_v11, %v4290_v39 }
 0x1b6   : > { %v4408_v45 = vpop.f32.mrf.mxu1  ;;  %v2943_v36 = vpop.f32.mrf.mxu0 }
 0x1b7   : > { %4640 = vst [vmem:[#allocation7_spill] sm:$0xff] %v4406_v62  ;;  %v2944_v53 = vadd.f32 %v2943_v36, %v2942_v28 }
 0x1b8   : > { %v4410_v8 = vpop.f32.mrf.mxu1  ;;  %v2945_v27 = vpop.f32.mrf.mxu0 }
 0x1b9   : > { %v4413_v48 = vadd.f32 %v2944_v53, %v4297_v51 }
 0x1ba   : > { %v4415_v33 = vpop.f32.mrf.mxu1  ;;  %v2946_v3 = vpop.f32.mrf.mxu0 }
 0x1bb   : > { %4641 = vst [vmem:[#allocation8_spill] sm:$0xff] %v4413_v48  ;;  %v2947_v25 = vadd.f32 %v2946_v3, %v2945_v27 }
 0x1bc   : > { %v4417_v35 = vpop.f32.mrf.mxu1  ;;  %v2948_v30 = vpop.f32.mrf.mxu0 }
 0x1bd   : > { %v4420_v39 = vadd.f32 %v2947_v25, %v4304_v1 }
 0x1be   : > { %v4422_v5 = vpop.f32.mrf.mxu1  ;;  %v2949_v12 = vpop.f32.mrf.mxu0 }
 0x1bf   : > { %4642 = vst [vmem:[#allocation9_spill] sm:$0xff] %v4420_v39  ;;  %v2950_v38 = vadd.f32 %v2949_v12, %v2948_v30 }
 0x1c0   : > { %v4424_v11 = vpop.f32.mrf.mxu1  ;;  %v2951_v28 = vpop.f32.mrf.mxu0 }
 0x1c1   : > { %v4427_v51 = vadd.f32 %v2950_v38, %v4311_v63 }
 0x1c2   : > { %v4429_v36 = vpop.f32.mrf.mxu1  ;;  %v2952_v53 = vpop.f32.mrf.mxu0 }
 0x1c3   : > { %4643 = vst [vmem:[#allocation10_spill] sm:$0xff] %v4427_v51  ;;  %v2953_v27 = vadd.f32 %v2952_v53, %v2951_v28 }
 0x1c4   : > { %v4431_v3 = vpop.f32.mrf.mxu1  ;;  %v2954_v61 = vpop.f32.mrf.mxu0 }
 0x1c5   : > { %v4434_v1 = vadd.f32 %v2953_v27, %v4318_v42 }
 0x1c6   : > { %v4436_v25 = vpop.f32.mrf.mxu1  ;;  %v2955_v39 = vpop.f32.mrf.mxu0 }
 0x1c7   : > { %4644 = vst [vmem:[#allocation11_spill] sm:$0xff] %v4434_v1  ;;  %v2956_v30 = vadd.f32 %v2955_v39, %v2954_v61 }
 0x1c8   : > { %v4438_v12 = vpop.f32.mrf.mxu1  ;;  %v2957_v48 = vpop.f32.mrf.mxu0 }
 0x1c9   : > { %v4441_v63 = vadd.f32 %v2956_v30, %v4325_v13  ;;  %v2990_v13 = vadd.f32 %v4366_v24, %v4361_v43  ;;  %v2993_v30 = vadd.f32 %v4373_v19, %v4368_v17  ;;  %v3002_v17 = vadd.f32 %v4394_v44, %v4389_v56 }
 0x1ca   : > { %v4443_v38 = vpop.f32.mrf.mxu1  ;;  %v2958_v51 = vpop.f32.mrf.mxu0 }
 0x1cb   : > { %4645 = vst [vmem:[#allocation12_spill] sm:$0xff] %v4441_v63  ;;  %v2959_v28 = vadd.f32 %v2958_v51, %v2957_v48 }
 0x1cc   : > { %v4445_v53 = vpop.f32.mrf.mxu1  ;;  %v2960_v46 = vpop.f32.mrf.mxu0 }
 0x1cd   : > { %v4448_v42 = vadd.f32 %v2959_v28, %v4332_v58 }
 0x1ce   : > { %v4450_v27 = vpop.f32.mrf.mxu1  ;;  %v2961_v61 = vpop.f32.mrf.mxu0 }
 0x1cf   : > { %4646 = vst [vmem:[#allocation13_spill] sm:$0xff] %v4448_v42  ;;  %v2962_v39 = vadd.f32 %v2961_v61, %v2960_v46  ;;  %v2987_v61 = vadd.f32 %v4359_v37, %v4351_v15  ;;  %v1803_v42 = vadd.f32 %v2990_v13, %v4258_v0 }
 0x1d0   : > { %v4452_v1 = vpop.f32.mrf.mxu1  ;;  %v4454_v62 = vpop.f32.mrf.mxu0 }
 0x1d1   : > { %v4459_v48 = vadd.f32 %v2962_v39, %v4339_v16  ;;  %v1798_v0 = vadd.f32 %v2987_v61, %v4251_v20  ;;  %v1819_v20 = vadd.f32 %v3002_v17, %v4286_v22  ;;  %v3014_v22 = vadd.f32 %v4422_v5, %v4417_v35 }
 0x1d2   : > { %v4461_v51 = vpop.f32.mrf.mxu1  ;;  %v4463_v58 = vpop.f32.mrf.mxu0  ;;  %v3011_v35 = vadd.f32 %v4415_v33, %v4410_v8  ;;  %v3026_v33 = vadd.f32 %v4450_v27, %v4445_v53  ;;  %v3023_v53 = vadd.f32 %v4443_v38, %v4438_v12 }
 0x1d3   : > { %4647 = vst [vmem:[#allocation14_spill] sm:$0xff] %v4459_v48  ;;  %4648 = vst [vmem:[#allocation15_spill] sm:$0xff] %v4463_v58  ;;  %v1806_v48 = vadd.f32 %v2993_v30, %v4265_v54  ;;  %v3005_v54 = vadd.f32 %v4401_v41, %v4396_v10 }
 0x1d4   : > { %v4467_v28 = vpop.f32.mrf.mxu1  ;;  %v3120_v46 = vpop.f32.mrf.mxu0 }
 0x1d5   : > { %v1964_v24 = vadd.f32 %v3120_v46, %v1803_v42  ;;  %v2996_v42 = vadd.f32 %v4380_v14, %v4375_v60 }
 0x1d6   : > { %v4472_v43 = vpop.f32.mrf.mxu1  ;;  %v1955_v16 = vpop.f32.mrf.mxu0 }
 0x1d7   : > { %v1956_v19 = vadd.f32 %v1955_v16, %v4354_v9  ;;  %v2084_v30 = vmax.f32 %v1964_v24, 0.0  ;;  %v2999_v9 = vadd.f32 %v4387_v59, %v4382_v6  ;;  %v1811_v41 = vadd.f32 %v2996_v42, %v4272_v49 }
 0x1d8   : > { %v4475_v39 = vpop.f32.mrf.mxu1  ;;  %v3121_v63 = vpop.f32.mrf.mxu0  ;;  %v1822_v6 = vadd.f32 %v3005_v54, %v4293_v21  ;;  %v3017_v49 = vadd.f32 %v4429_v36, %v4424_v11 }
 0x1d9   : > { %v1967_v15 = vadd.f32 %v3121_v63, %v1806_v48  ;;  %v2082_v63 = vmax.f32 %v1956_v19, 0.0 }
 0x1da   : > { %v4483_v37 = vpop.f32.mrf.mxu1  ;;  %v1958_v13 = vpop.f32.mrf.mxu0 }
 0x1db   : > { %v2085_v46 = vmax.f32 %v1967_v15, 0.0  ;;  %v1959_v58 = vadd.f32 %v1958_v13, %v1798_v0  ;;  %v1814_v15 = vadd.f32 %v2999_v9, %v4279_v52  ;;  %v3008_v0 = vadd.f32 %v4408_v45, %v4403_v57 }
 0x1dc   : > { %v4490_v56 = vpop.f32.mrf.mxu1  ;;  %v3124_v44 = vpop.f32.mrf.mxu0 }
 0x1dd   : > { %v2543_v48 = vpack.c.bf16 %v2085_v46, %v2084_v30  ;;  %v2083_v16 = vmax.f32 %v1959_v58, 0.0  ;;  %v1980_v10 = vadd.f32 %v3124_v44, %v1819_v20  ;;  %v1835_v44 = vadd.f32 %v3014_v22, %v4314_v7 }
 0x1de   : > { %v4495_v61 = vpop.f32.mrf.mxu1  ;;  %v1971_v60 = vpop.f32.mrf.mxu0 }
 0x1df   : > { %2615 = vst [vmem:[%s4497_s17 + $0x8] sm:$0xff] %v2543_v48   ;;  %v2538_v14 = vpack.c.bf16 %v2083_v16, %v2082_v63  ;;  %v1972_v58 = vadd.f32 %v1971_v60, %v1811_v41  ;;  %v2088_v42 = vmax.f32 %v1980_v10, 0.0  ;;  %v1827_v63 = vadd.f32 %v3008_v0, %v4300_v55 }
 0x1e0   : > { %v4501_v24 = vpop.f32.mrf.mxu1  ;;  %v3125_v59 = vpop.f32.mrf.mxu0  ;;  %v1838_v16 = vadd.f32 %v3017_v49, %v4321_v23  ;;  %v3020_v10 = vadd.f32 %v4436_v25, %v4431_v3  ;;  %v3029_v41 = vadd.f32 %v4461_v51, %v4452_v1  ;;  %v3038_v12 = vadd.f32 %v4495_v61, %v4490_v56 }
 0x1e1   : > { %2539 = vst [vmem:[%s4497_s17] sm:$0xff] %v2538_v14   ;;  %v1983_v17 = vadd.f32 %v3125_v59, %v1822_v6  ;;  %v2086_v46 = vmax.f32 %v1972_v58, 0.0  ;;  %v1830_v14 = vadd.f32 %v3011_v35, %v4307_v50  ;;  %v3032_v35 = vadd.f32 %v4472_v43, %v4467_v28 }
 0x1e2   : > { %v3040_v19 = vpop.f32.mrf.mxu1  ;;  %v1974_v13 = vpop.f32.mrf.mxu0  ;;  %v1843_v1 = vadd.f32 %v3020_v10, %v4328_v4  ;;  %v1854_v49 = vadd.f32 %v3029_v41, %v4349_v2  ;;  %v3035_v56 = vadd.f32 %v4483_v37, %v4475_v39 }
 0x1e3   : > { %v2089_v21 = vmax.f32 %v1983_v17, 0.0  ;;  %v1975_v54 = vadd.f32 %v1974_v13, %v1814_v15  ;;  %v1851_v15 = vadd.f32 %v3026_v33, %v4342_v47  ;;  %v1846_v47 = vadd.f32 %v3023_v53, %v4335_v29 }
 0x1e4   : > { %v4512_v30 = vpop.f32.mrf.mxu1  ;;  %v3128_v5 = vpop.f32.mrf.mxu0  ;;  %v3041_v4 = vadd.f32 %v3040_v19, %v4501_v24  ;;  %v1867_v29 = vadd.f32 %v3038_v12, %v4371_v32  ;;  %v1859_v24 = vadd.f32 %v3032_v35, %v4357_v40 }
 0x1e5   : > { %v2553_v52 = vpack.c.bf16 %v2089_v21, %v2088_v42  ;;  %v2087_v9 = vmax.f32 %v1975_v54, 0.0  ;;  %v1996_v36 = vadd.f32 %v3128_v5, %v1835_v44 }
 0x1e6   : > { %v4517_v57 = vpop.f32.mrf.mxu1  ;;  %v1987_v45 = vpop.f32.mrf.mxu0 }
 0x1e7   : > { %2617 = vst [vmem:[%s4497_s17 + $0x18] sm:$0xff] %v2553_v52   ;;  %v2548_v11 = vpack.c.bf16 %v2087_v9, %v2086_v46  ;;  %v1988_v20 = vadd.f32 %v1987_v45, %v1827_v63  ;;  %v2092_v23 = vmax.f32 %v1996_v36, 0.0  ;;  %v3044_v32 = vadd.f32 %v4517_v57, %v4512_v30 }
 0x1e8   : > { %v4521_v48 = vpop.f32.mrf.mxu1  ;;  %v3129_v8 = vpop.f32.mrf.mxu0 }
 0x1e9   : > { %2616 = vst [vmem:[%s4497_s17 + $0x10] sm:$0xff] %v2548_v11   ;;  %v1999_v60 = vadd.f32 %v3129_v8, %v1838_v16  ;;  %v2090_v58 = vmax.f32 %v1988_v20, 0.0  ;;  %v1870_v16 = vadd.f32 %v3041_v4, %v4378_v31 }
 0x1ea   : > { %v4527_v7 = vpop.f32.mrf.mxu1  ;;  %v1990_v55 = vpop.f32.mrf.mxu0 }
 0x1eb   : > { %v2093_v6 = vmax.f32 %v1999_v60, 0.0  ;;  %v1991_v59 = vadd.f32 %v1990_v55, %v1830_v14  ;;  %v1862_v60 = vadd.f32 %v3035_v56, %v4364_v26  ;;  %v3047_v31 = vadd.f32 %v4527_v7, %v4521_v48 }
 0x1ec   : > { %v3048_v22 = vpop.f32.mrf.mxu1  ;;  %v3132_v27 = vpop.f32.mrf.mxu0 }
 0x1ed   : > { %v2563_v17 = vpack.c.bf16 %v2093_v6, %v2092_v23  ;;  %v2091_v50 = vmax.f32 %v1991_v59, 0.0  ;;  %v2012_v13 = vadd.f32 %v3132_v27, %v1851_v15  ;;  %v4649_v15 = vld [vmem:[#allocation7_spill] sm:$0xff] }
 0x1ee   : > { %v3049_v0 = vpop.f32.mrf.mxu1  ;;  %v2003_v3 = vpop.f32.mrf.mxu0 }
 0x1ef   : > { %2619 = vst [vmem:[%s4497_s17 + $0x28] sm:$0xff] %v2563_v17   ;;  %v2558_v25 = vpack.c.bf16 %v2091_v50, %v2090_v58  ;;  %v2004_v38 = vadd.f32 %v2003_v3, %v1843_v1  ;;  %v2096_v46 = vmax.f32 %v2012_v13, 0.0  ;;  %v3050_v33 = vadd.f32 %v3049_v0, %v3048_v22  ;;  %v4650_v1 = vld [vmem:[#allocation6_spill] sm:$0xff] }
 0x1f0   : > { %v3051_v51 = vpop.f32.mrf.mxu1  ;;  %v3133_v42 = vpop.f32.mrf.mxu0  ;;  %v1875_v17 = vadd.f32 %v3044_v32, %v4385_v34 }
 0x1f1   : > { %2618 = vst [vmem:[%s4497_s17 + $0x20] sm:$0xff] %v2558_v25   ;;  %v2015_v21 = vadd.f32 %v3133_v42, %v1854_v49  ;;  %v2094_v44 = vmax.f32 %v2004_v38, 0.0  ;;  %v1883_v26 = vadd.f32 %v3050_v33, %v4399_v18 }
 0x1f2   : > { %v3052_v54 = vpop.f32.mrf.mxu1  ;;  %v2006_v5 = vpop.f32.mrf.mxu0 }
 0x1f3   : > { %v2097_v52 = vmax.f32 %v2015_v21, 0.0  ;;  %v2007_v2 = vadd.f32 %v2006_v5, %v1846_v47  ;;  %v3053_v10 = vadd.f32 %v3052_v54, %v3051_v51  ;;  %v1878_v51 = vadd.f32 %v3047_v31, %v4650_v1 }
 0x1f4   : > { %v3054_v9 = vpop.f32.mrf.mxu1  ;;  %v3136_v61 = vpop.f32.mrf.mxu0 }
 0x1f5   : > { %v2573_v45 = vpack.c.bf16 %v2097_v52, %v2096_v46  ;;  %v2095_v11 = vmax.f32 %v2007_v2, 0.0  ;;  %v2028_v43 = vadd.f32 %v3136_v61, %v1867_v29  ;;  %v1886_v0 = vadd.f32 %v3053_v10, %v4649_v15  ;;  %v4651_v46 = vld [vmem:[#allocation10_spill] sm:$0xff]  ;;  %v4653_v29 = vld [vmem:[#allocation11_spill] sm:$0xff]  ;;  %v4658_v15 = vld [vmem:[#allocation13_spill] sm:$0xff] }
 0x1f6   : > { %v3055_v36 = vpop.f32.mrf.mxu1  ;;  %v2019_v63 = vpop.f32.mrf.mxu0 }
 0x1f7   : > { %2621 = vst [vmem:[%s4497_s17 + $0x38] sm:$0xff] %v2573_v45   ;;  %v2568_v28 = vpack.c.bf16 %v2095_v11, %v2094_v44  ;;  %v2020_v39 = vadd.f32 %v2019_v63, %v1859_v24  ;;  %v2100_v55 = vmax.f32 %v2028_v43, 0.0  ;;  %v3056_v18 = vadd.f32 %v3055_v36, %v3054_v9  ;;  %v4652_v9 = vld [vmem:[#allocation8_spill] sm:$0xff] }
 0x1f8   : > { %v3057_v19 = vpop.f32.mrf.mxu1  ;;  %v3137_v8 = vpop.f32.mrf.mxu0 }
 0x1f9   : > { %2620 = vst [vmem:[%s4497_s17 + $0x30] sm:$0xff] %v2568_v28   ;;  %v2031_v37 = vadd.f32 %v3137_v8, %v1870_v16  ;;  %v2098_v59 = vmax.f32 %v2020_v39, 0.0  ;;  %v1891_v45 = vadd.f32 %v3056_v18, %v4652_v9 }
 0x1fa   : > { %v3058_v20 = vpop.f32.mrf.mxu1  ;;  %v2022_v14 = vpop.f32.mrf.mxu0 }
 0x1fb   : > { %v2101_v41 = vmax.f32 %v2031_v37, 0.0  ;;  %v2023_v40 = vadd.f32 %v2022_v14, %v1862_v60  ;;  %v3059_v34 = vadd.f32 %v3058_v20, %v3057_v19  ;;  %v4654_v19 = vld [vmem:[#allocation9_spill] sm:$0xff] }
 0x1fc   : > { %v3060_v23 = vpop.f32.mrf.mxu1  ;;  %v3140_v6 = vpop.f32.mrf.mxu0 }
 0x1fd   : > { %v2583_v22 = vpack.c.bf16 %v2101_v41, %v2100_v55  ;;  %v2099_v53 = vmax.f32 %v2023_v40, 0.0  ;;  %v2044_v57 = vadd.f32 %v3140_v6, %v1883_v26  ;;  %v1894_v16 = vadd.f32 %v3059_v34, %v4654_v19 }
 0x1fe   : > { %v3061_v27 = vpop.f32.mrf.mxu1  ;;  %v2035_v58 = vpop.f32.mrf.mxu0 }
 0x1ff   : > { %2623 = vst [vmem:[%s4497_s17 + $0x48] sm:$0xff] %v2583_v22   ;;  %v2578_v30 = vpack.c.bf16 %v2099_v53, %v2098_v59  ;;  %v3062_v25 = vadd.f32 %v3061_v27, %v3060_v23  ;;  %v2036_v48 = vadd.f32 %v2035_v58, %v1875_v17  ;;  %v2104_v42 = vmax.f32 %v2044_v57, 0.0  ;;  %v4655_v23 = vld [vmem:[#allocation15_spill] sm:$0xff]  ;;  %v4656_v53 = vld [vmem:[#allocation12_spill] sm:$0xff]  ;;  %v4657_v58 = vld [vmem:[#allocation14_spill] sm:$0xff] }
 0x200   : > { %v3063_v50 = vpop.f32.mrf.mxu1  ;;  %v3141_v3 = vpop.f32.mrf.mxu0  ;;  %v2965_v31 = vadd.f32 %v4655_v23, %v4454_v62 }
 0x201   : > { %2622 = vst [vmem:[%s4497_s17 + $0x40] sm:$0xff] %v2578_v30   ;;  %v2047_v7 = vadd.f32 %v3141_v3, %v1886_v0  ;;  %v2102_v35 = vmax.f32 %v2036_v48, 0.0  ;;  %v1899_v52 = vadd.f32 %v3062_v25, %v4651_v46  ;;  %v4659_v3 = vld [vmem:[#allocation5_spill] sm:$0xff] }
 0x202   : > { %v3064_v13 = vpop.f32.mrf.mxu1  ;;  %v2038_v49 = vpop.f32.mrf.mxu0  ;;  %v1757_v62 = vadd.f32 %v2965_v31, %v4659_v3 }
 0x203   : > { %v2105_v12 = vmax.f32 %v2047_v7, 0.0  ;;  %v3065_v38 = vadd.f32 %v3064_v13, %v3063_v50  ;;  %v2039_v21 = vadd.f32 %v2038_v49, %v1878_v51 }
 0x204   : > { %v3066_v54 = vpop.f32.mrf.mxu1  ;;  %v3144_v47 = vpop.f32.mrf.mxu0 }
 0x205   : > { %v2593_v5 = vpack.c.bf16 %v2105_v12, %v2104_v42  ;;  %v2103_v4 = vmax.f32 %v2039_v21, 0.0  ;;  %v2060_v44 = vadd.f32 %v3144_v47, %v1899_v52  ;;  %v1902_v36 = vadd.f32 %v3065_v38, %v4653_v29 }
 0x206   : > { %v3067_v2 = vpop.f32.mrf.mxu1  ;;  %v2051_v56 = vpop.f32.mrf.mxu0 }
 0x207   : > { %2625 = vst [vmem:[%s4497_s17 + $0x58] sm:$0xff] %v2593_v5   ;;  %v2588_v61 = vpack.c.bf16 %v2103_v4, %v2102_v35  ;;  %v2052_v28 = vadd.f32 %v2051_v56, %v1891_v45  ;;  %v2108_v33 = vmax.f32 %v2060_v44, 0.0  ;;  %v3068_v39 = vadd.f32 %v3067_v2, %v3066_v54 }
 0x208   : > { %v3069_v11 = vpop.f32.mrf.mxu1  ;;  %v3145_v63 = vpop.f32.mrf.mxu0 }
 0x209   : > { %2624 = vst [vmem:[%s4497_s17 + $0x50] sm:$0xff] %v2588_v61   ;;  %v2063_v43 = vadd.f32 %v3145_v63, %v1902_v36  ;;  %v2106_v14 = vmax.f32 %v2052_v28, 0.0  ;;  %v1907_v26 = vadd.f32 %v3068_v39, %v4656_v53 }
 0x20a   : > { %v3070_v24 = vpop.f32.mrf.mxu1  ;;  %v2054_v8 = vpop.f32.mrf.mxu0 }
 0x20b   : > { %v2109_v37 = vmax.f32 %v2063_v43, 0.0  ;;  %v2055_v20 = vadd.f32 %v2054_v8, %v1894_v16  ;;  %v3071_v55 = vadd.f32 %v3070_v24, %v3069_v11 }
 0x20c   : > { %v3072_v60 = vpop.f32.mrf.mxu1  ;;  %v3148_v32 = vpop.f32.mrf.mxu0 }
 0x20d   : > { %v2603_v10 = vpack.c.bf16 %v2109_v37, %v2108_v33  ;;  %v2107_v41 = vmax.f32 %v2055_v20, 0.0  ;;  %v1910_v0 = vadd.f32 %v3071_v55, %v4658_v15 }
 0x20e   : > { %v3073_v40 = vpop.f32.mrf.mxu1  ;;  %v2067_v59 = vpop.f32.mrf.mxu0 }
 0x20f   : > { %v3074_v6 = vadd.f32 %v3073_v40, %v3072_v60  ;;  %2627 = vst [vmem:[%s4497_s17 + $0x68] sm:$0xff] %v2603_v10   ;;  %v2598_v22 = vpack.c.bf16 %v2107_v41, %v2106_v14  ;;  %v2068_v17 = vadd.f32 %v2067_v59, %v1907_v26 }
 0x210   : > { %v3075_v27 = vpop.f32.mrf.mxu1  ;;  %v3149_v57 = vpop.f32.mrf.mxu0 }
 0x211   : > { %v1915_v30 = vadd.f32 %v3074_v6, %v4657_v58  ;;  %2626 = vst [vmem:[%s4497_s17 + $0x60] sm:$0xff] %v2598_v22   ;;  %v2110_v51 = vmax.f32 %v2068_v17, 0.0 }
 0x212   : > { %v3076_v50 = vpop.f32.mrf.mxu1  ;;  %v2070_v48 = vpop.f32.mrf.mxu0 }
 0x213   : > { %v3077_v25 = vadd.f32 %v3076_v50, %v3075_v27  ;;  %v2071_v7 = vadd.f32 %v2070_v48, %v1910_v0  ;;  %v2076_v13 = vadd.f32 %v3148_v32, %v1915_v30 }
 0x215   : > { %v1918_v1 = vadd.f32 %v3077_v25, %v1757_v62  ;;  %v2111_v18 = vmax.f32 %v2071_v7, 0.0  ;;  %v2112_v12 = vmax.f32 %v2076_v13, 0.0 }
 0x217   : > { %v2079_v49 = vadd.f32 %v3149_v57, %v1918_v1  ;;  %v2608_v42 = vpack.c.bf16 %v2111_v18, %v2110_v51 }
 0x219   : > { %v2113_v38 = vmax.f32 %v2079_v49, 0.0  ;;  %2628 = vst [vmem:[%s4497_s17 + $0x70] sm:$0xff] %v2608_v42  }
 0x21b   : > { %v2613_v21 = vpack.c.bf16 %v2113_v38, %v2112_v12 }
 0x21d   : > { %2629 = vst [vmem:[%s4497_s17 + $0x78] sm:$0xff] %v2613_v21  }
 0x21e   : > { %3334 = shalt.err (!%p3331_p3)
}
 0x21f   : > { %s3335_s5 = scalar_lea.hbm %s4585_s26, 2048  ;;  %s3339_s8 = scalar_lea.hbm %s4635_s3, 4096 }
 0x220   : > { %p3336_p4 = scmp.ne.s32.totalorder %s4585_s26, %s3335_s5  ;;  %p3340_p9 = scmp.lt.s32.totalorder %s4585_s26, %s4635_s3 }
 0x221   : > { %p3341_p10 = scmp.lt.s32.totalorder %s3339_s8, %s3335_s5 }
 0x222   : > { %p3337_p7 = pnand %p3336_p4, %p3444_p5 }
 0x223   : > { %p3342_p11 = por %p3341_p10, %p3340_p9 }
 0x224   : > { %p3338_p8 = pneg %p3337_p7 }
 0x226   : > { %p3343_p12 = pnand %p3342_p11, %p3338_p8 }
 0x228   : > { %3346 = shalt.err (!%p3343_p12)
}
 0x229   : > { %s3384_s30 = smov 64   ;;  %s3385_s11 = smov 4  }
 0x22a   : > { %3167 = dma.vmem_to_hbm [thread:$0]  (%p3444_p5), %s4587_s20, 2048, %s4585_s26, %s4592_s27, %s3384_s30, %s3384_s30, %s3385_s11  }
 0x22b PF: > { %p3173_p13 = scmp.ge.s32.totalorder %s3381_s15, 2  ;;  %s2303_s17 = sand.u32 1, %s3369_s12  }
 0x22c   : > { %s2304_s19 = scalar_lea.sflag [#allocation3], %s2303_s17 }
 0x22d   : > { %p3170_p0 = pnand %p3173_p13, %p3448_p6 }
 0x22f   : > { %p3171_p1 = pneg %p3170_p0 }
 0x231   : > { %3364 = dma.done.wait (%p3171_p1), %s2304_s19, 2048  }
 0x232   : > { %3366 = vsyncadd (%p3171_p1), %s2304_s19, 4294965248  ;;  %p13_p2 = scmp.ge.s32.totalorder %s3431_s18, 4   ;;  %s4660_s12 = smov %s3373_s13 }
 0x233   : > { %s4661_s13 = smov %s3377_s14  ;;  %s4662_s14 = smov %s3442_s21 }
 0x234   : > { %s4663_s15 = smov %s3431_s18  ;;  %15 = sbr.rel (!%p13_p2) target bundleno = 3 (0x3), region = 67 }
 0x239   :  { %2309 = vsyncpa [#allocation3], 1 }
 0x23a   :  { %2311 = vsyncpa [#allocation3 + $0x1], 1 }

</bundles_post_ra>
